<compile_context>
chip_gen: v5e
topology: v5e:2x2
jax: 0.10.0
libtpu: 0.0.40
codegen_flags: <defaults>
</compile_context>

<pallas_src>
import math
import numpy as np
import jax
import jax.numpy as jnp
from jax import lax
from jax.experimental import pallas as pl
from jax.experimental.pallas import tpu as pltpu

HIDDEN = 32                 # hidden_dim
EDIM = 2 * HIDDEN           # bidirectional encoder width == attention embed_dim
MEL = EDIM                  # mel_dim (must equal 2*hidden_dim, see NOTE above)
NHEADS = 8
HEAD = EDIM // NHEADS
VOCAB = 50
N_SPEAKERS = 100
TEXT_LEN = 8

CHUNK = 16                  # decoder steps per pallas_call
OUT_W = 128                 # lane-dense fused output width: [mel | stop | attn | pad]

_VMEM = pl.BlockSpec(memory_space=pltpu.MemorySpace.VMEM)


# ----------------------------------------------------------------------------
# Kernel 1: bidirectional LSTM text encoder, both directions fused into one
# statically-unrolled recurrence via block-diagonal packed weights.
# Packed gate layout (width 8H): [i_f|i_b | f_f|f_b | g_f|g_b | o_f|o_b],
# state layout (width 2H): [fwd | bwd].
# ----------------------------------------------------------------------------
def bilstm_kernel(x_ref, wih_ref, whh_ref, b_ref, out_ref):
    T, H = x_ref.shape
    H2 = 2 * H
    wih = wih_ref[...]                      # (2H, 8H) block-diagonal packed
    whh = whh_ref[...]                      # (2H, 8H) block-diagonal packed
    b = b_ref[...]                          # (1, 8H)

    lane = lax.broadcasted_iota(jnp.int32, (1, 4 * H2), 1)
    is_g = (lane >= 2 * H2) & (lane < 3 * H2)   # g-gate lanes -> tanh, rest sigmoid

    h = jnp.zeros((1, H2), jnp.float32)
    c = jnp.zeros((1, H2), jnp.float32)
    fwd_rows = [None] * T
    bwd_rows = [None] * T
    for s in range(T):                      # static unroll (T == 8)
        tb = T - 1 - s
        xcat = jnp.concatenate([x_ref[s:s + 1, :], x_ref[tb:tb + 1, :]], axis=-1)
        gates = (jnp.dot(xcat, wih, preferred_element_type=jnp.float32)
                 + jnp.dot(h, whh, preferred_element_type=jnp.float32) + b)
        act = jnp.where(is_g, jnp.tanh(gates), jax.nn.sigmoid(gates))
        i = act[:, 0:H2]
        f = act[:, H2:2 * H2]
        g = act[:, 2 * H2:3 * H2]
        o = act[:, 3 * H2:4 * H2]
        c = f * c + i * g
        h = o * jnp.tanh(c)
        fwd_rows[s] = h[:, 0:H]             # forward output for position s
        bwd_rows[tb] = h[:, H:H2]           # backward output for position T-1-s
    out_f = jnp.concatenate(fwd_rows, axis=0)         # (T, H)
    out_b = jnp.concatenate(bwd_rows, axis=0)         # (T, H)
    out_ref[...] = jnp.concatenate([out_f, out_b], axis=-1)   # single (T, 2H) store


@jax.jit
def encode_text(x_emb, params):
    T, H = x_emb.shape
    return pl.pallas_call(
        bilstm_kernel,
        out_shape=jax.ShapeDtypeStruct((T, 2 * H), jnp.float32),
        in_specs=[_VMEM] * 4,
        out_specs=_VMEM,
    )(x_emb, params['enc_wih'], params['enc_whh'], params['enc_b'])


# ----------------------------------------------------------------------------
# Kernel 2: CHUNK autoregressive decoder steps per call.
# Each step = MultiheadAttention(dec_in, enc, enc) -> concat -> LSTM cell
# (zero initial state) -> mel/stop projection.  Output is a lane-dense
# (CHUNK, 128) slab: columns [0:MEL) mel, [MEL] stop logit, [MEL+1:MEL+1+T)
# head-averaged attention weights, rest zero.
# ----------------------------------------------------------------------------
def decoder_chunk_kernel(dec_in_ref, enc_ref,
                         wq_ref, bq_ref, wk_ref, bk_ref, wv_ref, bv_ref,
                         wo_ref, bo_ref, dec_wih_ref, dec_b_ref,
                         wout_ref, bout_ref, out_ref):
    enc = enc_ref[...]                                  # (T, E)
    T, E = enc.shape
    H = HIDDEN
    hd = E // NHEADS
    scale = 1.0 / math.sqrt(hd)

    # K / V depend only on enc -> compute once per chunk, keep resident in VMEM.
    k = jnp.dot(enc, wk_ref[...], preferred_element_type=jnp.float32) + bk_ref[...]   # (T, E)
    v = jnp.dot(enc, wv_ref[...], preferred_element_type=jnp.float32) + bv_ref[...]   # (T, E)

    wq = wq_ref[...]
    bq = bq_ref[...]
    wo = wo_ref[...]
    bo = bo_ref[...]
    dec_wih = dec_wih_ref[...]
    dec_b = dec_b_ref[...]
    w_out = wout_ref[...]                               # (H, OUT_W) = [Wmel | Wstop | 0]
    b_out = bout_ref[...]                               # (1, OUT_W) = [bmel | bstop | 0]

    # Constants built once (hoisted out of the step loop).
    head_sum = (lax.broadcasted_iota(jnp.int32, (E, NHEADS), 0) // hd
                == lax.broadcasted_iota(jnp.int32, (E, NHEADS), 1)).astype(jnp.float32)
    head_expand = (lax.broadcasted_iota(jnp.int32, (NHEADS, E), 0)
                   == lax.broadcasted_iota(jnp.int32, (NHEADS, E), 1) // hd
                   ).astype(jnp.float32)
    # Places the (T,1) head-averaged attention column into lanes [MEL+1, MEL+1+T).
    attn_place = (lax.broadcasted_iota(jnp.int32, (T, OUT_W), 1)
                  == lax.broadcasted_iota(jnp.int32, (T, OUT_W), 0) + (MEL + 1)
                  ).astype(jnp.float32)
    lane4h = lax.broadcasted_iota(jnp.int32, (1, 4 * H), 1)
    is_g = (lane4h >= 2 * H) & (lane4h < 3 * H)

    def step(s, dec_in):
        # ---- multi-head attention, all heads at once ----
        q = jnp.dot(dec_in, wq, preferred_element_type=jnp.float32) + bq             # (1, E)
        scores = jnp.dot(k * q, head_sum, preferred_element_type=jnp.float32) * scale  # (T, NH)
        m = jnp.max(scores, axis=0, keepdims=True)
        p = jnp.exp(scores - m)
        probs = p / jnp.sum(p, axis=0, keepdims=True)                                 # (T, NH)
        probs_e = jnp.dot(probs, head_expand, preferred_element_type=jnp.float32)     # (T, E)
        attended = jnp.sum(probs_e * v, axis=0, keepdims=True)                        # (1, E)
        attended = jnp.dot(attended, wo, preferred_element_type=jnp.float32) + bo     # (1, E)
        attn_col = jnp.mean(probs, axis=1, keepdims=True)                             # (T, 1)

        # ---- decoder LSTM cell, zero initial state (f-gate is dead: c0 == 0) ----
        lstm_in = jnp.concatenate([attended, dec_in], axis=-1)                        # (1, E+MEL)
        gates = jnp.dot(lstm_in, dec_wih, preferred_element_type=jnp.float32) + dec_b
        act = jnp.where(is_g, jnp.tanh(gates), jax.nn.sigmoid(gates))
        i_g = act[:, 0:H]
        g_g = act[:, 2 * H:3 * H]
        o_g = act[:, 3 * H:4 * H]
        c = i_g * g_g
        h_dec = o_g * jnp.tanh(c)                                                     # (1, H)

        # ---- fused lane-dense output row: [mel | stop | attn | 0] ----
        row = (jnp.dot(h_dec, w_out, preferred_element_type=jnp.float32) + b_out
               + jnp.sum(attn_col * attn_place, axis=0, keepdims=True))               # (1, OUT_W)
        out_ref[pl.ds(s, 1), :] = row
        return row[:, 0:MEL]                               # next step's dec_in = mel

    lax.fori_loop(0, CHUNK, step, dec_in_ref[...])


@jax.jit
def decode_chunk(dec_in, enc, params):
    T = enc.shape[0]
    assert MEL + 1 + T <= OUT_W
    return pl.pallas_call(
        decoder_chunk_kernel,
        out_shape=jax.ShapeDtypeStruct((CHUNK, OUT_W), jnp.float32),
        in_specs=[_VMEM] * 14,
        out_specs=_VMEM,
    )(dec_in, enc,
      params['wq'], params['bq'], params['wk'], params['bk'],
      params['wv'], params['bv'], params['wo'], params['bo'],
      params['dec_wih'], params['dec_b'], params['w_out'], params['b_out'])


# ----------------------------------------------------------------------------
# Full forward (glue): embeddings, chunked autoregressive loop with one host
# stop-check per chunk.
# ----------------------------------------------------------------------------
def tts_forward(text_tokens, params, speaker_id=None):
    B, T = text_tokens.shape
    assert B == 1, "reference module's .item() stop check implies batch size 1"

    text_emb = params['text_emb'][text_tokens[0]]              # (T, H)
    if speaker_id is not None:
        text_emb = text_emb + params['spk_emb'][speaker_id[0]][None, :]

    enc = encode_text(text_emb, params)                        # (T, 2H)

    max_len = min(1000, T * 10)
    dec_in = jnp.zeros((1, MEL), jnp.float32)
    mel_parts, stop_parts = [], []
    attn_last = None

    # TODO(synk): the reference's data-dependent `break` has no in-kernel
    # equivalent; it is handled with CHUNK decoder steps per kernel launch and
    # one host-side stop check per chunk (extra steps past the stop are
    # computed but discarded, which is numerically identical to the reference).
    for start in range(0, max_len, CHUNK):
        slab = decode_chunk(dec_in, enc, params)               # (CHUNK, OUT_W)
        slab_np = np.asarray(jax.device_get(slab))             # one host sync / chunk
        n_valid = min(CHUNK, max_len - start)
        stop_logits = slab_np[:n_valid, MEL]
        hits = np.nonzero(stop_logits > 0.0)[0]                # sigmoid(x)>0.5 <=> x>0
        n_keep = int(hits[0]) + 1 if hits.size else n_valid
        mel_parts.append(slab_np[:n_keep, :MEL])
        stop_parts.append(slab_np[:n_keep, MEL:MEL + 1])
        attn_last = slab_np[n_keep - 1, MEL + 1:MEL + 1 + T]
        if hits.size:
            break
        dec_in = jnp.asarray(slab_np[n_valid - 1:n_valid, :MEL])

    mel_output = jnp.asarray(np.concatenate(mel_parts, axis=0))[None]     # (1, Td, MEL)
    stop_output = jnp.asarray(np.concatenate(stop_parts, axis=0))[None]   # (1, Td, 1)
    attention_weights = jnp.asarray(attn_last)[None, None, :]             # (1, 1, T)
    return {'mel_output': mel_output,
            'stop_output': stop_output,
            'attention_weights': attention_weights}


# ----------------------------------------------------------------------------
# Deterministic parameter initialization + packing (shapes follow __init__).
# ----------------------------------------------------------------------------
def init_params(key):
    keys = iter(jax.random.split(key, 32))

    def nrm(shape, scale=0.1):
        return (scale * jax.random.normal(next(keys), shape)).astype(jnp.float32)

    H, E, M = HIDDEN, EDIM, MEL

    # embeddings
    text_emb = nrm((VOCAB, H), 1.0)
    spk_emb = nrm((N_SPEAKERS, H), 1.0)

    # bidirectional text encoder LSTM (pre-transposed, biases summed per direction)
    wih_f = nrm((H, 4 * H)); whh_f = nrm((H, 4 * H)); b_f = nrm((1, 4 * H))
    wih_b = nrm((H, 4 * H)); whh_b = nrm((H, 4 * H)); b_b = nrm((1, 4 * H))

    def pack_dir(w_f, w_b):      # -> (2H, 8H) block diagonal, gate blocks of 2H
        big = jnp.zeros((2 * H, 8 * H), jnp.float32)
        for g in range(4):
            big = big.at[0:H, g * 2 * H:g * 2 * H + H].set(w_f[:, g * H:(g + 1) * H])
            big = big.at[H:2 * H, g * 2 * H + H:(g + 1) * 2 * H].set(w_b[:, g * H:(g + 1) * H])
        return big

    def pack_bias(bf, bb):       # -> (1, 8H)
        big = jnp.zeros((1, 8 * H), jnp.float32)
        for g in range(4):
            big = big.at[:, g * 2 * H:g * 2 * H + H].set(bf[:, g * H:(g + 1) * H])
            big = big.at[:, g * 2 * H + H:(g + 1) * 2 * H].set(bb[:, g * H:(g + 1) * H])
        return big

    # multi-head attention (in_proj split into q/k/v, pre-transposed)
    wq = nrm((E, E)); bq = nrm((1, E))
    wk = nrm((E, E)); bk = nrm((1, E))
    wv = nrm((E, E)); bv = nrm((1, E))
    wo = nrm((E, E)); bo = nrm((1, E))

    # decoder LSTM (input = attended(E) ++ mel(M)), biases summed; W_hh dropped
    # (it multiplies the zero initial hidden state in the reference).
    dec_wih = nrm((E + M, 4 * H)); dec_b = nrm((1, 4 * H))

    # mel / stop projections packed into one lane-dense (H, OUT_W) matrix
    wmel = nrm((H, M)); bmel = nrm((1, M))
    wstop = nrm((H, 1)); bstop = nrm((1, 1))
    w_out = (jnp.zeros((H, OUT_W), jnp.float32)
             .at[:, 0:M].set(wmel).at[:, M:M + 1].set(wstop))
    b_out = (jnp.zeros((1, OUT_W), jnp.float32)
             .at[:, 0:M].set(bmel).at[:, M:M + 1].set(bstop))

    return {
        'text_emb': text_emb, 'spk_emb': spk_emb,
        'enc_wih': pack_dir(wih_f, wih_b),
        'enc_whh': pack_dir(whh_f, whh_b),
        'enc_b': pack_bias(b_f, b_b),
        'wq': wq, 'bq': bq, 'wk': wk, 'bk': bk, 'wv': wv, 'bv': bv,
        'wo': wo, 'bo': bo,
        'dec_wih': dec_wih, 'dec_b': dec_b,
        'w_out': w_out, 'b_out': b_out,
    }


if __name__ == "__main__":
    key = jax.random.PRNGKey(0)
    pkey, tkey = jax.random.split(key)
    params = init_params(pkey)

    text_tokens = jax.random.randint(tkey, (1, TEXT_LEN), 0, VOCAB, dtype=jnp.int32)
    speaker_id = jnp.array([3], dtype=jnp.int32)

    out = tts_forward(text_tokens, params, speaker_id)
    jax.block_until_ready(out['mel_output'])
    jax.block_until_ready(out['stop_output'])
    jax.block_until_ready(out['attention_weights'])

    n_dec = out['mel_output'].shape[1]
    assert out['mel_output'].shape == (1, n_dec, MEL)
    assert out['stop_output'].shape == (1, n_dec, 1)
    assert 1 <= n_dec <= min(1000, TEXT_LEN * 10)
    assert out['attention_weights'].shape == (1, 1, TEXT_LEN)
    print("KERNEL_OK")
</pallas_src>

<mosaic_0001>
module attributes {stable_mosaic.version = 11 : i64} {
  func.func @bilstm_kernel(%arg0: memref<8x32xf32, #tpu.memory_space<vmem>>, %arg1: memref<64x256xf32, #tpu.memory_space<vmem>>, %arg2: memref<64x256xf32, #tpu.memory_space<vmem>>, %arg3: memref<1x256xf32, #tpu.memory_space<vmem>>, %arg4: memref<8x64xf32, #tpu.memory_space<vmem>>) attributes {dimension_semantics = [], scalar_prefetch = 0 : i64, scratch_operands = 0 : i64, tpu.core_type = #tpu.core_type<tc>} {
    %c0 = arith.constant 0 : index
    %c0_0 = arith.constant 0 : index
    %0 = vector.load %arg1[%c0, %c0_0] : memref<64x256xf32, #tpu.memory_space<vmem>>, vector<64x256xf32>
    %c0_1 = arith.constant 0 : index
    %c0_2 = arith.constant 0 : index
    %1 = vector.load %arg2[%c0_1, %c0_2] : memref<64x256xf32, #tpu.memory_space<vmem>>, vector<64x256xf32>
    %c0_3 = arith.constant 0 : index
    %c0_4 = arith.constant 0 : index
    %2 = vector.load %arg3[%c0_3, %c0_4] : memref<1x256xf32, #tpu.memory_space<vmem>>, vector<1x256xf32>
    %3 = tpu.iota {dimensions = array<i32: 1>} : vector<1x256xi32>
    %c128_i32 = arith.constant 128 : i32
    %4 = vector.broadcast %c128_i32 : i32 to vector<1x256xi32>
    %5 = arith.cmpi sge, %3, %4 : vector<1x256xi32>
    %c192_i32 = arith.constant 192 : i32
    %6 = vector.broadcast %c192_i32 : i32 to vector<1x256xi32>
    %7 = arith.cmpi slt, %3, %6 : vector<1x256xi32>
    %8 = arith.andi %5, %7 : vector<1x256xi1>
    %cst = arith.constant 0.000000e+00 : f32
    %9 = vector.broadcast %cst : f32 to vector<1x64xf32>
    %cst_5 = arith.constant 0.000000e+00 : f32
    %10 = vector.broadcast %cst_5 : f32 to vector<1x64xf32>
    %c0_6 = arith.constant 0 : index
    %c0_7 = arith.constant 0 : index
    %11 = vector.load %arg0[%c0_6, %c0_7] : memref<8x32xf32, #tpu.memory_space<vmem>>, vector<1x32xf32>
    %c7 = arith.constant 7 : index
    %c0_8 = arith.constant 0 : index
    %12 = vector.load %arg0[%c7, %c0_8] : memref<8x32xf32, #tpu.memory_space<vmem>>, vector<1x32xf32>
    %13 = tpu.concatenate %11, %12 in 1 : vector<1x32xf32>, vector<1x32xf32> -> vector<1x64xf32>
    %cst_9 = arith.constant dense<0.000000e+00> : vector<1x256xf32>
    %14 = tpu.matmul %13, %0, %cst_9 {dimension_numbers = #tpu.dot_dimension_numbers<[1], [0], [0], [1], [0, 0, 1, 1], [], []>} : vector<1x64xf32>, vector<64x256xf32>, vector<1x256xf32> -> vector<1x256xf32>
    %cst_10 = arith.constant dense<0.000000e+00> : vector<1x256xf32>
    %15 = tpu.matmul %9, %1, %cst_10 {dimension_numbers = #tpu.dot_dimension_numbers<[1], [0], [0], [1], [0, 0, 1, 1], [], []>} : vector<1x64xf32>, vector<64x256xf32>, vector<1x256xf32> -> vector<1x256xf32>
    %16 = arith.addf %14, %15 : vector<1x256xf32>
    %17 = arith.addf %16, %2 : vector<1x256xf32>
    %18 = math.tanh %17 : vector<1x256xf32>
    %19 = arith.negf %17 : vector<1x256xf32>
    %20 = math.exp %19 : vector<1x256xf32>
    %cst_11 = arith.constant 1.000000e+00 : f32
    %21 = vector.broadcast %cst_11 : f32 to vector<1x256xf32>
    %22 = arith.addf %21, %20 : vector<1x256xf32>
    %23 = arith.divf %21, %22 : vector<1x256xf32>
    %24 = arith.select %8, %18, %23 : vector<1x256xi1>, vector<1x256xf32>
    %25 = vector.extract_strided_slice %24 {offsets = [0, 0], sizes = [1, 64], strides = [1, 1]} : vector<1x256xf32> to vector<1x64xf32>
    %26 = vector.extract_strided_slice %24 {offsets = [0, 64], sizes = [1, 64], strides = [1, 1]} : vector<1x256xf32> to vector<1x64xf32>
    %27 = vector.extract_strided_slice %24 {offsets = [0, 128], sizes = [1, 64], strides = [1, 1]} : vector<1x256xf32> to vector<1x64xf32>
    %28 = vector.extract_strided_slice %24 {offsets = [0, 192], sizes = [1, 64], strides = [1, 1]} : vector<1x256xf32> to vector<1x64xf32>
    %29 = arith.mulf %26, %10 : vector<1x64xf32>
    %30 = arith.mulf %25, %27 : vector<1x64xf32>
    %31 = arith.addf %29, %30 : vector<1x64xf32>
    %32 = math.tanh %31 : vector<1x64xf32>
    %33 = arith.mulf %28, %32 : vector<1x64xf32>
    %34 = vector.extract_strided_slice %33 {offsets = [0, 0], sizes = [1, 32], strides = [1, 1]} : vector<1x64xf32> to vector<1x32xf32>
    %35 = vector.extract_strided_slice %33 {offsets = [0, 32], sizes = [1, 32], strides = [1, 1]} : vector<1x64xf32> to vector<1x32xf32>
    %c1 = arith.constant 1 : index
    %c0_12 = arith.constant 0 : index
    %36 = vector.load %arg0[%c1, %c0_12] : memref<8x32xf32, #tpu.memory_space<vmem>>, vector<1x32xf32>
    %c6 = arith.constant 6 : index
    %c0_13 = arith.constant 0 : index
    %37 = vector.load %arg0[%c6, %c0_13] : memref<8x32xf32, #tpu.memory_space<vmem>>, vector<1x32xf32>
    %38 = tpu.concatenate %36, %37 in 1 : vector<1x32xf32>, vector<1x32xf32> -> vector<1x64xf32>
    %cst_14 = arith.constant dense<0.000000e+00> : vector<1x256xf32>
    %39 = tpu.matmul %38, %0, %cst_14 {dimension_numbers = #tpu.dot_dimension_numbers<[1], [0], [0], [1], [0, 0, 1, 1], [], []>} : vector<1x64xf32>, vector<64x256xf32>, vector<1x256xf32> -> vector<1x256xf32>
    %cst_15 = arith.constant dense<0.000000e+00> : vector<1x256xf32>
    %40 = tpu.matmul %33, %1, %cst_15 {dimension_numbers = #tpu.dot_dimension_numbers<[1], [0], [0], [1], [0, 0, 1, 1], [], []>} : vector<1x64xf32>, vector<64x256xf32>, vector<1x256xf32> -> vector<1x256xf32>
    %41 = arith.addf %39, %40 : vector<1x256xf32>
    %42 = arith.addf %41, %2 : vector<1x256xf32>
    %43 = math.tanh %42 : vector<1x256xf32>
    %44 = arith.negf %42 : vector<1x256xf32>
    %45 = math.exp %44 : vector<1x256xf32>
    %cst_16 = arith.constant 1.000000e+00 : f32
    %46 = vector.broadcast %cst_16 : f32 to vector<1x256xf32>
    %47 = arith.addf %46, %45 : vector<1x256xf32>
    %48 = arith.divf %46, %47 : vector<1x256xf32>
    %49 = arith.select %8, %43, %48 : vector<1x256xi1>, vector<1x256xf32>
    %50 = vector.extract_strided_slice %49 {offsets = [0, 0], sizes = [1, 64], strides = [1, 1]} : vector<1x256xf32> to vector<1x64xf32>
    %51 = vector.extract_strided_slice %49 {offsets = [0, 64], sizes = [1, 64], strides = [1, 1]} : vector<1x256xf32> to vector<1x64xf32>
    %52 = vector.extract_strided_slice %49 {offsets = [0, 128], sizes = [1, 64], strides = [1, 1]} : vector<1x256xf32> to vector<1x64xf32>
    %53 = vector.extract_strided_slice %49 {offsets = [0, 192], sizes = [1, 64], strides = [1, 1]} : vector<1x256xf32> to vector<1x64xf32>
    %54 = arith.mulf %51, %31 : vector<1x64xf32>
    %55 = arith.mulf %50, %52 : vector<1x64xf32>
    %56 = arith.addf %54, %55 : vector<1x64xf32>
    %57 = math.tanh %56 : vector<1x64xf32>
    %58 = arith.mulf %53, %57 : vector<1x64xf32>
    %59 = vector.extract_strided_slice %58 {offsets = [0, 0], sizes = [1, 32], strides = [1, 1]} : vector<1x64xf32> to vector<1x32xf32>
    %60 = vector.extract_strided_slice %58 {offsets = [0, 32], sizes = [1, 32], strides = [1, 1]} : vector<1x64xf32> to vector<1x32xf32>
    %c2 = arith.constant 2 : index
    %c0_17 = arith.constant 0 : index
    %61 = vector.load %arg0[%c2, %c0_17] : memref<8x32xf32, #tpu.memory_space<vmem>>, vector<1x32xf32>
    %c5 = arith.constant 5 : index
    %c0_18 = arith.constant 0 : index
    %62 = vector.load %arg0[%c5, %c0_18] : memref<8x32xf32, #tpu.memory_space<vmem>>, vector<1x32xf32>
    %63 = tpu.concatenate %61, %62 in 1 : vector<1x32xf32>, vector<1x32xf32> -> vector<1x64xf32>
    %cst_19 = arith.constant dense<0.000000e+00> : vector<1x256xf32>
    %64 = tpu.matmul %63, %0, %cst_19 {dimension_numbers = #tpu.dot_dimension_numbers<[1], [0], [0], [1], [0, 0, 1, 1], [], []>} : vector<1x64xf32>, vector<64x256xf32>, vector<1x256xf32> -> vector<1x256xf32>
    %cst_20 = arith.constant dense<0.000000e+00> : vector<1x256xf32>
    %65 = tpu.matmul %58, %1, %cst_20 {dimension_numbers = #tpu.dot_dimension_numbers<[1], [0], [0], [1], [0, 0, 1, 1], [], []>} : vector<1x64xf32>, vector<64x256xf32>, vector<1x256xf32> -> vector<1x256xf32>
    %66 = arith.addf %64, %65 : vector<1x256xf32>
    %67 = arith.addf %66, %2 : vector<1x256xf32>
    %68 = math.tanh %67 : vector<1x256xf32>
    %69 = arith.negf %67 : vector<1x256xf32>
    %70 = math.exp %69 : vector<1x256xf32>
    %cst_21 = arith.constant 1.000000e+00 : f32
    %71 = vector.broadcast %cst_21 : f32 to vector<1x256xf32>
    %72 = arith.addf %71, %70 : vector<1x256xf32>
    %73 = arith.divf %71, %72 : vector<1x256xf32>
    %74 = arith.select %8, %68, %73 : vector<1x256xi1>, vector<1x256xf32>
    %75 = vector.extract_strided_slice %74 {offsets = [0, 0], sizes = [1, 64], strides = [1, 1]} : vector<1x256xf32> to vector<1x64xf32>
    %76 = vector.extract_strided_slice %74 {offsets = [0, 64], sizes = [1, 64], strides = [1, 1]} : vector<1x256xf32> to vector<1x64xf32>
    %77 = vector.extract_strided_slice %74 {offsets = [0, 128], sizes = [1, 64], strides = [1, 1]} : vector<1x256xf32> to vector<1x64xf32>
    %78 = vector.extract_strided_slice %74 {offsets = [0, 192], sizes = [1, 64], strides = [1, 1]} : vector<1x256xf32> to vector<1x64xf32>
    %79 = arith.mulf %76, %56 : vector<1x64xf32>
    %80 = arith.mulf %75, %77 : vector<1x64xf32>
    %81 = arith.addf %79, %80 : vector<1x64xf32>
    %82 = math.tanh %81 : vector<1x64xf32>
    %83 = arith.mulf %78, %82 : vector<1x64xf32>
    %84 = vector.extract_strided_slice %83 {offsets = [0, 0], sizes = [1, 32], strides = [1, 1]} : vector<1x64xf32> to vector<1x32xf32>
    %85 = vector.extract_strided_slice %83 {offsets = [0, 32], sizes = [1, 32], strides = [1, 1]} : vector<1x64xf32> to vector<1x32xf32>
    %c3 = arith.constant 3 : index
    %c0_22 = arith.constant 0 : index
    %86 = vector.load %arg0[%c3, %c0_22] : memref<8x32xf32, #tpu.memory_space<vmem>>, vector<1x32xf32>
    %c4 = arith.constant 4 : index
    %c0_23 = arith.constant 0 : index
    %87 = vector.load %arg0[%c4, %c0_23] : memref<8x32xf32, #tpu.memory_space<vmem>>, vector<1x32xf32>
    %88 = tpu.concatenate %86, %87 in 1 : vector<1x32xf32>, vector<1x32xf32> -> vector<1x64xf32>
    %cst_24 = arith.constant dense<0.000000e+00> : vector<1x256xf32>
    %89 = tpu.matmul %88, %0, %cst_24 {dimension_numbers = #tpu.dot_dimension_numbers<[1], [0], [0], [1], [0, 0, 1, 1], [], []>} : vector<1x64xf32>, vector<64x256xf32>, vector<1x256xf32> -> vector<1x256xf32>
    %cst_25 = arith.constant dense<0.000000e+00> : vector<1x256xf32>
    %90 = tpu.matmul %83, %1, %cst_25 {dimension_numbers = #tpu.dot_dimension_numbers<[1], [0], [0], [1], [0, 0, 1, 1], [], []>} : vector<1x64xf32>, vector<64x256xf32>, vector<1x256xf32> -> vector<1x256xf32>
    %91 = arith.addf %89, %90 : vector<1x256xf32>
    %92 = arith.addf %91, %2 : vector<1x256xf32>
    %93 = math.tanh %92 : vector<1x256xf32>
    %94 = arith.negf %92 : vector<1x256xf32>
    %95 = math.exp %94 : vector<1x256xf32>
    %cst_26 = arith.constant 1.000000e+00 : f32
    %96 = vector.broadcast %cst_26 : f32 to vector<1x256xf32>
    %97 = arith.addf %96, %95 : vector<1x256xf32>
    %98 = arith.divf %96, %97 : vector<1x256xf32>
    %99 = arith.select %8, %93, %98 : vector<1x256xi1>, vector<1x256xf32>
    %100 = vector.extract_strided_slice %99 {offsets = [0, 0], sizes = [1, 64], strides = [1, 1]} : vector<1x256xf32> to vector<1x64xf32>
    %101 = vector.extract_strided_slice %99 {offsets = [0, 64], sizes = [1, 64], strides = [1, 1]} : vector<1x256xf32> to vector<1x64xf32>
    %102 = vector.extract_strided_slice %99 {offsets = [0, 128], sizes = [1, 64], strides = [1, 1]} : vector<1x256xf32> to vector<1x64xf32>
    %103 = vector.extract_strided_slice %99 {offsets = [0, 192], sizes = [1, 64], strides = [1, 1]} : vector<1x256xf32> to vector<1x64xf32>
    %104 = arith.mulf %101, %81 : vector<1x64xf32>
    %105 = arith.mulf %100, %102 : vector<1x64xf32>
    %106 = arith.addf %104, %105 : vector<1x64xf32>
    %107 = math.tanh %106 : vector<1x64xf32>
    %108 = arith.mulf %103, %107 : vector<1x64xf32>
    %109 = vector.extract_strided_slice %108 {offsets = [0, 0], sizes = [1, 32], strides = [1, 1]} : vector<1x64xf32> to vector<1x32xf32>
    %110 = vector.extract_strided_slice %108 {offsets = [0, 32], sizes = [1, 32], strides = [1, 1]} : vector<1x64xf32> to vector<1x32xf32>
    %c4_27 = arith.constant 4 : index
    %c0_28 = arith.constant 0 : index
    %111 = vector.load %arg0[%c4_27, %c0_28] : memref<8x32xf32, #tpu.memory_space<vmem>>, vector<1x32xf32>
    %c3_29 = arith.constant 3 : index
    %c0_30 = arith.constant 0 : index
    %112 = vector.load %arg0[%c3_29, %c0_30] : memref<8x32xf32, #tpu.memory_space<vmem>>, vector<1x32xf32>
    %113 = tpu.concatenate %111, %112 in 1 : vector<1x32xf32>, vector<1x32xf32> -> vector<1x64xf32>
    %cst_31 = arith.constant dense<0.000000e+00> : vector<1x256xf32>
    %114 = tpu.matmul %113, %0, %cst_31 {dimension_numbers = #tpu.dot_dimension_numbers<[1], [0], [0], [1], [0, 0, 1, 1], [], []>} : vector<1x64xf32>, vector<64x256xf32>, vector<1x256xf32> -> vector<1x256xf32>
    %cst_32 = arith.constant dense<0.000000e+00> : vector<1x256xf32>
    %115 = tpu.matmul %108, %1, %cst_32 {dimension_numbers = #tpu.dot_dimension_numbers<[1], [0], [0], [1], [0, 0, 1, 1], [], []>} : vector<1x64xf32>, vector<64x256xf32>, vector<1x256xf32> -> vector<1x256xf32>
    %116 = arith.addf %114, %115 : vector<1x256xf32>
    %117 = arith.addf %116, %2 : vector<1x256xf32>
    %118 = math.tanh %117 : vector<1x256xf32>
    %119 = arith.negf %117 : vector<1x256xf32>
    %120 = math.exp %119 : vector<1x256xf32>
    %cst_33 = arith.constant 1.000000e+00 : f32
    %121 = vector.broadcast %cst_33 : f32 to vector<1x256xf32>
    %122 = arith.addf %121, %120 : vector<1x256xf32>
    %123 = arith.divf %121, %122 : vector<1x256xf32>
    %124 = arith.select %8, %118, %123 : vector<1x256xi1>, vector<1x256xf32>
    %125 = vector.extract_strided_slice %124 {offsets = [0, 0], sizes = [1, 64], strides = [1, 1]} : vector<1x256xf32> to vector<1x64xf32>
    %126 = vector.extract_strided_slice %124 {offsets = [0, 64], sizes = [1, 64], strides = [1, 1]} : vector<1x256xf32> to vector<1x64xf32>
    %127 = vector.extract_strided_slice %124 {offsets = [0, 128], sizes = [1, 64], strides = [1, 1]} : vector<1x256xf32> to vector<1x64xf32>
    %128 = vector.extract_strided_slice %124 {offsets = [0, 192], sizes = [1, 64], strides = [1, 1]} : vector<1x256xf32> to vector<1x64xf32>
    %129 = arith.mulf %126, %106 : vector<1x64xf32>
    %130 = arith.mulf %125, %127 : vector<1x64xf32>
    %131 = arith.addf %129, %130 : vector<1x64xf32>
    %132 = math.tanh %131 : vector<1x64xf32>
    %133 = arith.mulf %128, %132 : vector<1x64xf32>
    %134 = vector.extract_strided_slice %133 {offsets = [0, 0], sizes = [1, 32], strides = [1, 1]} : vector<1x64xf32> to vector<1x32xf32>
    %135 = vector.extract_strided_slice %133 {offsets = [0, 32], sizes = [1, 32], strides = [1, 1]} : vector<1x64xf32> to vector<1x32xf32>
    %c5_34 = arith.constant 5 : index
    %c0_35 = arith.constant 0 : index
    %136 = vector.load %arg0[%c5_34, %c0_35] : memref<8x32xf32, #tpu.memory_space<vmem>>, vector<1x32xf32>
    %c2_36 = arith.constant 2 : index
    %c0_37 = arith.constant 0 : index
    %137 = vector.load %arg0[%c2_36, %c0_37] : memref<8x32xf32, #tpu.memory_space<vmem>>, vector<1x32xf32>
    %138 = tpu.concatenate %136, %137 in 1 : vector<1x32xf32>, vector<1x32xf32> -> vector<1x64xf32>
    %cst_38 = arith.constant dense<0.000000e+00> : vector<1x256xf32>
    %139 = tpu.matmul %138, %0, %cst_38 {dimension_numbers = #tpu.dot_dimension_numbers<[1], [0], [0], [1], [0, 0, 1, 1], [], []>} : vector<1x64xf32>, vector<64x256xf32>, vector<1x256xf32> -> vector<1x256xf32>
    %cst_39 = arith.constant dense<0.000000e+00> : vector<1x256xf32>
    %140 = tpu.matmul %133, %1, %cst_39 {dimension_numbers = #tpu.dot_dimension_numbers<[1], [0], [0], [1], [0, 0, 1, 1], [], []>} : vector<1x64xf32>, vector<64x256xf32>, vector<1x256xf32> -> vector<1x256xf32>
    %141 = arith.addf %139, %140 : vector<1x256xf32>
    %142 = arith.addf %141, %2 : vector<1x256xf32>
    %143 = math.tanh %142 : vector<1x256xf32>
    %144 = arith.negf %142 : vector<1x256xf32>
    %145 = math.exp %144 : vector<1x256xf32>
    %cst_40 = arith.constant 1.000000e+00 : f32
    %146 = vector.broadcast %cst_40 : f32 to vector<1x256xf32>
    %147 = arith.addf %146, %145 : vector<1x256xf32>
    %148 = arith.divf %146, %147 : vector<1x256xf32>
    %149 = arith.select %8, %143, %148 : vector<1x256xi1>, vector<1x256xf32>
    %150 = vector.extract_strided_slice %149 {offsets = [0, 0], sizes = [1, 64], strides = [1, 1]} : vector<1x256xf32> to vector<1x64xf32>
    %151 = vector.extract_strided_slice %149 {offsets = [0, 64], sizes = [1, 64], strides = [1, 1]} : vector<1x256xf32> to vector<1x64xf32>
    %152 = vector.extract_strided_slice %149 {offsets = [0, 128], sizes = [1, 64], strides = [1, 1]} : vector<1x256xf32> to vector<1x64xf32>
    %153 = vector.extract_strided_slice %149 {offsets = [0, 192], sizes = [1, 64], strides = [1, 1]} : vector<1x256xf32> to vector<1x64xf32>
    %154 = arith.mulf %151, %131 : vector<1x64xf32>
    %155 = arith.mulf %150, %152 : vector<1x64xf32>
    %156 = arith.addf %154, %155 : vector<1x64xf32>
    %157 = math.tanh %156 : vector<1x64xf32>
    %158 = arith.mulf %153, %157 : vector<1x64xf32>
    %159 = vector.extract_strided_slice %158 {offsets = [0, 0], sizes = [1, 32], strides = [1, 1]} : vector<1x64xf32> to vector<1x32xf32>
    %160 = vector.extract_strided_slice %158 {offsets = [0, 32], sizes = [1, 32], strides = [1, 1]} : vector<1x64xf32> to vector<1x32xf32>
    %c6_41 = arith.constant 6 : index
    %c0_42 = arith.constant 0 : index
    %161 = vector.load %arg0[%c6_41, %c0_42] : memref<8x32xf32, #tpu.memory_space<vmem>>, vector<1x32xf32>
    %c1_43 = arith.constant 1 : index
    %c0_44 = arith.constant 0 : index
    %162 = vector.load %arg0[%c1_43, %c0_44] : memref<8x32xf32, #tpu.memory_space<vmem>>, vector<1x32xf32>
    %163 = tpu.concatenate %161, %162 in 1 : vector<1x32xf32>, vector<1x32xf32> -> vector<1x64xf32>
    %cst_45 = arith.constant dense<0.000000e+00> : vector<1x256xf32>
    %164 = tpu.matmul %163, %0, %cst_45 {dimension_numbers = #tpu.dot_dimension_numbers<[1], [0], [0], [1], [0, 0, 1, 1], [], []>} : vector<1x64xf32>, vector<64x256xf32>, vector<1x256xf32> -> vector<1x256xf32>
    %cst_46 = arith.constant dense<0.000000e+00> : vector<1x256xf32>
    %165 = tpu.matmul %158, %1, %cst_46 {dimension_numbers = #tpu.dot_dimension_numbers<[1], [0], [0], [1], [0, 0, 1, 1], [], []>} : vector<1x64xf32>, vector<64x256xf32>, vector<1x256xf32> -> vector<1x256xf32>
    %166 = arith.addf %164, %165 : vector<1x256xf32>
    %167 = arith.addf %166, %2 : vector<1x256xf32>
    %168 = math.tanh %167 : vector<1x256xf32>
    %169 = arith.negf %167 : vector<1x256xf32>
    %170 = math.exp %169 : vector<1x256xf32>
    %cst_47 = arith.constant 1.000000e+00 : f32
    %171 = vector.broadcast %cst_47 : f32 to vector<1x256xf32>
    %172 = arith.addf %171, %170 : vector<1x256xf32>
    %173 = arith.divf %171, %172 : vector<1x256xf32>
    %174 = arith.select %8, %168, %173 : vector<1x256xi1>, vector<1x256xf32>
    %175 = vector.extract_strided_slice %174 {offsets = [0, 0], sizes = [1, 64], strides = [1, 1]} : vector<1x256xf32> to vector<1x64xf32>
    %176 = vector.extract_strided_slice %174 {offsets = [0, 64], sizes = [1, 64], strides = [1, 1]} : vector<1x256xf32> to vector<1x64xf32>
    %177 = vector.extract_strided_slice %174 {offsets = [0, 128], sizes = [1, 64], strides = [1, 1]} : vector<1x256xf32> to vector<1x64xf32>
    %178 = vector.extract_strided_slice %174 {offsets = [0, 192], sizes = [1, 64], strides = [1, 1]} : vector<1x256xf32> to vector<1x64xf32>
    %179 = arith.mulf %176, %156 : vector<1x64xf32>
    %180 = arith.mulf %175, %177 : vector<1x64xf32>
    %181 = arith.addf %179, %180 : vector<1x64xf32>
    %182 = math.tanh %181 : vector<1x64xf32>
    %183 = arith.mulf %178, %182 : vector<1x64xf32>
    %184 = vector.extract_strided_slice %183 {offsets = [0, 0], sizes = [1, 32], strides = [1, 1]} : vector<1x64xf32> to vector<1x32xf32>
    %185 = vector.extract_strided_slice %183 {offsets = [0, 32], sizes = [1, 32], strides = [1, 1]} : vector<1x64xf32> to vector<1x32xf32>
    %c7_48 = arith.constant 7 : index
    %c0_49 = arith.constant 0 : index
    %186 = vector.load %arg0[%c7_48, %c0_49] : memref<8x32xf32, #tpu.memory_space<vmem>>, vector<1x32xf32>
    %c0_50 = arith.constant 0 : index
    %c0_51 = arith.constant 0 : index
    %187 = vector.load %arg0[%c0_50, %c0_51] : memref<8x32xf32, #tpu.memory_space<vmem>>, vector<1x32xf32>
    %188 = tpu.concatenate %186, %187 in 1 : vector<1x32xf32>, vector<1x32xf32> -> vector<1x64xf32>
    %cst_52 = arith.constant dense<0.000000e+00> : vector<1x256xf32>
    %189 = tpu.matmul %188, %0, %cst_52 {dimension_numbers = #tpu.dot_dimension_numbers<[1], [0], [0], [1], [0, 0, 1, 1], [], []>} : vector<1x64xf32>, vector<64x256xf32>, vector<1x256xf32> -> vector<1x256xf32>
    %cst_53 = arith.constant dense<0.000000e+00> : vector<1x256xf32>
    %190 = tpu.matmul %183, %1, %cst_53 {dimension_numbers = #tpu.dot_dimension_numbers<[1], [0], [0], [1], [0, 0, 1, 1], [], []>} : vector<1x64xf32>, vector<64x256xf32>, vector<1x256xf32> -> vector<1x256xf32>
    %191 = arith.addf %189, %190 : vector<1x256xf32>
    %192 = arith.addf %191, %2 : vector<1x256xf32>
    %193 = math.tanh %192 : vector<1x256xf32>
    %194 = arith.negf %192 : vector<1x256xf32>
    %195 = math.exp %194 : vector<1x256xf32>
    %cst_54 = arith.constant 1.000000e+00 : f32
    %196 = vector.broadcast %cst_54 : f32 to vector<1x256xf32>
    %197 = arith.addf %196, %195 : vector<1x256xf32>
    %198 = arith.divf %196, %197 : vector<1x256xf32>
    %199 = arith.select %8, %193, %198 : vector<1x256xi1>, vector<1x256xf32>
    %200 = vector.extract_strided_slice %199 {offsets = [0, 0], sizes = [1, 64], strides = [1, 1]} : vector<1x256xf32> to vector<1x64xf32>
    %201 = vector.extract_strided_slice %199 {offsets = [0, 64], sizes = [1, 64], strides = [1, 1]} : vector<1x256xf32> to vector<1x64xf32>
    %202 = vector.extract_strided_slice %199 {offsets = [0, 128], sizes = [1, 64], strides = [1, 1]} : vector<1x256xf32> to vector<1x64xf32>
    %203 = vector.extract_strided_slice %199 {offsets = [0, 192], sizes = [1, 64], strides = [1, 1]} : vector<1x256xf32> to vector<1x64xf32>
    %204 = arith.mulf %201, %181 : vector<1x64xf32>
    %205 = arith.mulf %200, %202 : vector<1x64xf32>
    %206 = arith.addf %204, %205 : vector<1x64xf32>
    %207 = math.tanh %206 : vector<1x64xf32>
    %208 = arith.mulf %203, %207 : vector<1x64xf32>
    %209 = vector.extract_strided_slice %208 {offsets = [0, 0], sizes = [1, 32], strides = [1, 1]} : vector<1x64xf32> to vector<1x32xf32>
    %210 = vector.extract_strided_slice %208 {offsets = [0, 32], sizes = [1, 32], strides = [1, 1]} : vector<1x64xf32> to vector<1x32xf32>
    %211 = tpu.concatenate %34, %59, %84, %109, %134, %159, %184, %209 in 0 : vector<1x32xf32>, vector<1x32xf32>, vector<1x32xf32>, vector<1x32xf32>, vector<1x32xf32>, vector<1x32xf32>, vector<1x32xf32>, vector<1x32xf32> -> vector<8x32xf32>
    %212 = tpu.concatenate %210, %185, %160, %135, %110, %85, %60, %35 in 0 : vector<1x32xf32>, vector<1x32xf32>, vector<1x32xf32>, vector<1x32xf32>, vector<1x32xf32>, vector<1x32xf32>, vector<1x32xf32>, vector<1x32xf32> -> vector<8x32xf32>
    %213 = tpu.concatenate %211, %212 in 1 : vector<8x32xf32>, vector<8x32xf32> -> vector<8x64xf32>
    %c0_55 = arith.constant 0 : index
    %c0_56 = arith.constant 0 : index
    %214 = vector.load %arg4[%c0_55, %c0_56] : memref<8x64xf32, #tpu.memory_space<vmem>>, vector<8x64xf32>
    tpu.vector_store %arg4[%c0_55, %c0_56], %213 {strides = array<i32>} : memref<8x64xf32, #tpu.memory_space<vmem>>, vector<8x64xf32>,
    return
  }
}

</mosaic_0001>

<bundles_post_ra>
// kernel: encode_text.1
= control target key start
LH: loop header
LB: loop body
LE: loop exit
PB: predicated region body
PF: predicated region fallthrough
CT: control target
= control target key end

     0   :  { %9 = vsyncpa [#allocation3], 0  ;;  %s2274_s0 = inlined_call_operand.hbm [shape: f32[8,32], index: 0, kind: input, shape index: {}]   ;;  %s2275_s1 = inlined_call_operand.hbm [shape: f32[64,256], index: 1, kind: input, shape index: {}]   ;;  %s2276_s2 = inlined_call_operand.hbm [shape: f32[64,256], index: 2, kind: input, shape index: {}]   ;;  %s2277_s3 = inlined_call_operand.hbm [shape: f32[1,256], index: 3, kind: input, shape index: {}]   ;;  %s2278_s4 = inlined_call_operand.hbm [shape: f32[8,64], index: 4, kind: output, shape index: {}]  }
   0x1   :  { %10 = vsyncpa [#allocation6], 0 }
   0x2   :  { %11 = vsyncpa [#allocation9], 0  ;;  %s28_s17 = sshll.u32 %s2275_s1, 4  ;;  %s29_s17 = int_to_ptr.hbm [resolvable:$true] %s28_s17 }
   0x3   :  { %12 = vsyncpa [#allocation4], 0  ;;  %s1692_s18 = smov [#allocation5]   ;;  %s18_s22 = sshll.u32 %s2274_s0, 4  ;;  %s19_s22 = int_to_ptr.hbm [resolvable:$true] %s18_s22 }
   0x4   :  { %s30_s19 = sshll.u32 %s1692_s18, 4  ;;  %s1693_s23 = smov 256   ;;  %s31_s19 = int_to_ptr.vmem [resolvable:$true] %s30_s19 }
   0x5   :  { %s1694_s24 = smov 16   ;;  %s1695_s25 = smov [#allocation2]  }
   0x6   :  { %36 = dma.hbm_to_vmem [thread:$0]  %s29_s17, 2048, %s31_s19, [#allocation6], %s1693_s23, %s1693_s23, %s1694_s24  }
   0x7   :  { %s20_s26 = sshll.u32 %s1695_s25, 4  ;;  %s41_s29 = sshll.u32 %s2276_s2, 4  ;;  %s21_s26 = int_to_ptr.vmem [resolvable:$true] %s20_s26  ;;  %s42_s29 = int_to_ptr.hbm [resolvable:$true] %s41_s29 }
   0x8   :  { %23 = dma.hbm_to_vmem [thread:$0]  %s19_s22, 128, %s21_s26, [#allocation3]  }
   0x9   :  { %s55_s5 = sshll.u32 %s2277_s3, 4  ;;  %s1696_s6 = smov [#allocation7]   ;;  %s56_s5 = int_to_ptr.hbm [resolvable:$true] %s55_s5 }
   0xa   :  { %s43_s7 = sshll.u32 %s1696_s6, 4  ;;  %s1697_s0 = smov [#allocation8]   ;;  %s44_s7 = int_to_ptr.vmem [resolvable:$true] %s43_s7 }
   0xb   :  { %49 = dma.hbm_to_vmem [thread:$0]  %s42_s29, 2048, %s44_s7, [#allocation6], %s1693_s23, %s1693_s23, %s1694_s24  }
   0xc   :  { %s57_s8 = sshll.u32 %s1697_s0, 4  ;;  %s58_s8 = int_to_ptr.vmem [resolvable:$true] %s57_s8 }
   0xd   :  { %60 = dma.hbm_to_vmem [thread:$0]  %s56_s5, 32, %s58_s8, [#allocation9]  }
   0xe   :  { %1684 = dma.done.wait [#allocation3], 128  }
   0xf   :  { %1685 = vsyncadd [#allocation3], 4294967168 }
  0x10   :  { %1686 = dma.done.wait [#allocation6], 4096  }
  0x11   :  { %1687 = vsyncadd [#allocation6], 4294963200 }
  0x12   :  { %1688 = dma.done.wait [#allocation9], 32  }
  0x13   :  { %1689 = vsyncadd [#allocation9], 4294967264  ;;  %v120_v0 = vld [vmem:[#allocation2 + $0x7] sm:$0x1]  ;;  %v1739_v1 = vld [vmem:[#allocation5 + $0x70] sm:$0xff]  ;;  %s1698_s2 = smov 32   ;;  %v110_v54 = vlaneseq }
  0x14   :  { %v1741_v2 = vld [vmem:[#allocation5 + $0x78] sm:$0xff]  ;;  %122 = vrot.lane.b32.xlu0 %v120_v0, %s1698_s2  ;;  %182 = vmatpush.msra.mxu2 %v1739_v1  ;;  %v1745_v3 = vld [vmem:[#allocation5 + $0x60] sm:$0xff]  ;;  %v1747_v4 = vld [vmem:[#allocation5 + $0x68] sm:$0xff]  ;;  %v1699_v33 = vmov 0.0   ;;  %vm125_vm0 = vcmask 261120   ;;  %vm2279_vm1 = vcmask 523264  }
  0x15   :  { %202 = vmatpush.msra.mxu3 %v1741_v2  ;;  %v1750_v5 = vld [vmem:[#allocation5 + $0x50] sm:$0xff]  ;;  %v1754_v7 = vld [vmem:[#allocation7 + $0x78] sm:$0xff]  ;;  %v1760_v9 = vld [vmem:[#allocation7 + $0x60] sm:$0xff]  ;;  %v111_v56 = vand.u32 127, %v110_v54  ;;  %s1700_s3 = smov 64   ;;  %s1701_s9 = smov [#allocation10]  }
  0x16   :  { %v1752_v6 = vld [vmem:[#allocation7 + $0x70] sm:$0xff]  ;;  %183 = vmatpush.msra.mxu2 %v1745_v3  ;;  %v1757_v8 = vld [vmem:[#allocation5 + $0x58] sm:$0xff]  ;;  %159 = vmatpush.msra.mxu1 %v1754_v7  ;;  %v1764_v10 = vld [vmem:[#allocation5 + $0x40] sm:$0xff]  ;;  %s1365_s10 = sshll.u32 %s1701_s9, 4  ;;  %s1367_s13 = sshll.u32 %s2278_s4, 4  ;;  %s1366_s10 = int_to_ptr.vmem [resolvable:$true] %s1365_s10  ;;  %s1368_s13 = int_to_ptr.hbm [resolvable:$true] %s1367_s13 }
  0x17   :  { %139 = vmatpush.msra.mxu0 %v1752_v6  ;;  %203 = vmatpush.msra.mxu3 %v1747_v4  ;;  %v1766_v11 = vld [vmem:[#allocation7 + $0x68] sm:$0xff]  ;;  %v1772_v13 = vld [vmem:[#allocation7 + $0x50] sm:$0xff]  ;;  %v1774_v14 = vld [vmem:[#allocation7 + $0x58] sm:$0xff]  ;;  %v1912_v61 = vadd.s32 128, %v111_v56 }
  0x18   :  { %184 = vmatpush.msra.mxu2 %v1750_v5  ;;  %v1769_v12 = vld [vmem:[#allocation5 + $0x48] sm:$0xff]  ;;  %160 = vmatpush.msra.mxu1 %v1766_v11  ;;  %v1778_v15 = vld [vmem:[#allocation5 + $0x30] sm:$0xff]  ;;  %v1780_v16 = vld [vmem:[#allocation7 + $0x40] sm:$0xff] }
  0x19   :  { %140 = vmatpush.msra.mxu0 %v1760_v9  ;;  %204 = vmatpush.msra.mxu3 %v1757_v8  ;;  %v1783_v17 = vld [vmem:[#allocation5 + $0x38] sm:$0xff]  ;;  %v1786_v18 = vld [vmem:[#allocation7 + $0x48] sm:$0xff]  ;;  %v1790_v19 = vld [vmem:[#allocation5 + $0x20] sm:$0xff]  ;;  %vm116_vm7 = vcmp.lt.s32.totalorder %v1912_v61, 192 }
  0x1a   :  { %185 = vmatpush.msra.mxu2 %v1764_v10  ;;  %161 = vmatpush.msra.mxu1 %v1774_v14  ;;  %v1793_v20 = vld [vmem:[#allocation5 + $0x28] sm:$0xff]  ;;  %v1798_v21 = vld [vmem:[#allocation5 + $0x10] sm:$0xff]  ;;  %v1801_v22 = vld [vmem:[#allocation5 + $0x18] sm:$0xff] }
  0x1b   :  { %141 = vmatpush.msra.mxu0 %v1772_v13  ;;  %205 = vmatpush.msra.mxu3 %v1769_v12  ;;  %v1806_v23 = vld [vmem:[#allocation7 + $0x30] sm:$0xff]  ;;  %v1808_v24 = vld [vmem:[#allocation7 + $0x38] sm:$0xff]  ;;  %v1810_v25 = vld [vmem:[#allocation5] sm:$0xff] }
  0x1c   :  { %186 = vmatpush.msra.mxu2 %v1778_v15  ;;  %162 = vmatpush.msra.mxu1 %v1786_v18  ;;  %v1814_v26 = vld [vmem:[#allocation5 + $0x8] sm:$0xff]  ;;  %v1818_v27 = vld [vmem:[#allocation7 + $0x20] sm:$0xff]  ;;  %v1822_v29 = vld [vmem:[#allocation7 + $0x10] sm:$0xff] }
  0x1d   :  { %142 = vmatpush.msra.mxu0 %v1780_v16  ;;  %206 = vmatpush.msra.mxu3 %v1783_v17  ;;  %v1820_v28 = vld [vmem:[#allocation7 + $0x28] sm:$0xff]  ;;  %v1826_v30 = vld [vmem:[#allocation7 + $0x18] sm:$0xff]  ;;  %v1828_v31 = vld [vmem:[#allocation7] sm:$0xff] }
  0x1e   :  { %187 = vmatpush.msra.mxu2 %v1790_v19  ;;  %163 = vmatpush.msra.mxu1 %v1808_v24  ;;  %v1830_v32 = vld [vmem:[#allocation7 + $0x8] sm:$0xff]  ;;  %v1874_v34 = vld [vmem:[#allocation2] sm:$0x1]  ;;  %v109_v37 = vld [vmem:[#allocation8] sm:$0x3] }
  0x1f   :  { %207 = vmatpush.msra.mxu3 %v1793_v20  ;;  %143 = vmatpush.msra.mxu0 %v1806_v23  ;;  %v1906_v40 = vperm.slane %v109_v37, 0  ;;  %v1908_v41 = vperm.slane %v109_v37, 1 }
  0x20   :  { %188 = vmatpush.msra.mxu2 %v1798_v21  ;;  %164 = vmatpush.msra.mxu1 %v1820_v28 }
  0x21   :  { %208 = vmatpush.msra.mxu3 %v1801_v22  ;;  %144 = vmatpush.msra.mxu0 %v1818_v27 }
  0x22   :  { %189 = vmatpush.msra.mxu2 %v1810_v25  ;;  %165 = vmatpush.msra.mxu1 %v1826_v30 }
  0x23   :  { %209 = vmatpush.msra.mxu3 %v1814_v26  ;;  %145 = vmatpush.msra.mxu0 %v1822_v29 }
  0x24   :  { %335 = vmatpush.msrb.mxu2 %v1739_v1  ;;  %166 = vmatpush.msra.mxu1 %v1830_v32 }
  0x25   :  { %355 = vmatpush.msrb.mxu3 %v1741_v2  ;;  %146 = vmatpush.msra.mxu0 %v1828_v31 }
  0x26   :  { %336 = vmatpush.msrb.mxu2 %v1745_v3  ;;  %147 = vmatmul.f32.vlgmr.msra.gmra.mxu0 %v1699_v33 }
  0x27   :  { %356 = vmatpush.msrb.mxu3 %v1747_v4  ;;  %167 = vmatmul.f32.vlgmr.msra.gmra.mxu1 %v1699_v33 }
  0x28   :  { %337 = vmatpush.msrb.mxu2 %v1750_v5  ;;  %292 = vmatpush.msrb.mxu0 %v1752_v6 }
  0x29   :  { %357 = vmatpush.msrb.mxu3 %v1757_v8  ;;  %312 = vmatpush.msrb.mxu1 %v1754_v7 }
  0x2a   :  { %338 = vmatpush.msrb.mxu2 %v1764_v10  ;;  %293 = vmatpush.msrb.mxu0 %v1760_v9 }
  0x2b   :  { %358 = vmatpush.msrb.mxu3 %v1769_v12  ;;  %313 = vmatpush.msrb.mxu1 %v1766_v11 }
  0x2c   :  { %339 = vmatpush.msrb.mxu2 %v1778_v15  ;;  %294 = vmatpush.msrb.mxu0 %v1772_v13 }
  0x2d   :  { %359 = vmatpush.msrb.mxu3 %v1783_v17  ;;  %314 = vmatpush.msrb.mxu1 %v1774_v14 }
  0x2e   :  { %340 = vmatpush.msrb.mxu2 %v1790_v19  ;;  %295 = vmatpush.msrb.mxu0 %v1780_v16 }
  0x2f   :  { %360 = vmatpush.msrb.mxu3 %v1793_v20  ;;  %315 = vmatpush.msrb.mxu1 %v1786_v18 }
  0x30   :  { %341 = vmatpush.msrb.mxu2 %v1798_v21  ;;  %296 = vmatpush.msrb.mxu0 %v1806_v23 }
  0x31   :  { %361 = vmatpush.msrb.mxu3 %v1801_v22  ;;  %316 = vmatpush.msrb.mxu1 %v1808_v24 }
  0x32   :  { %342 = vmatpush.msrb.mxu2 %v1810_v25  ;;  %297 = vmatpush.msrb.mxu0 %v1818_v27 }
  0x33   :  { %362 = vmatpush.msrb.mxu3 %v1814_v26  ;;  %317 = vmatpush.msrb.mxu1 %v1820_v28 }
  0x34   :  { %298 = vmatpush.msrb.mxu0 %v1822_v29 }
  0x35   :  { %318 = vmatpush.msrb.mxu1 %v1826_v30 }
  0x36   :  { %299 = vmatpush.msrb.mxu0 %v1828_v31 }
  0x37   :  { %319 = vmatpush.msrb.mxu1 %v1830_v32 }
  0x38   :  { %440 = vmatpush.msra.mxu0 %v1752_v6 }
  0x39   :  { %460 = vmatpush.msra.mxu1 %v1754_v7 }
  0x3a   :  { %441 = vmatpush.msra.mxu0 %v1760_v9 }
  0x3b   :  { %461 = vmatpush.msra.mxu1 %v1766_v11 }
  0x3c   :  { %442 = vmatpush.msra.mxu0 %v1772_v13 }
  0x3d   :  { %462 = vmatpush.msra.mxu1 %v1774_v14 }
  0x3e   :  { %443 = vmatpush.msra.mxu0 %v1780_v16 }
  0x3f   :  { %463 = vmatpush.msra.mxu1 %v1786_v18 }
  0x40   :  { %444 = vmatpush.msra.mxu0 %v1806_v23 }
  0x41   :  { %464 = vmatpush.msra.mxu1 %v1808_v24 }
  0x42   :  { %445 = vmatpush.msra.mxu0 %v1818_v27 }
  0x43   :  { %465 = vmatpush.msra.mxu1 %v1820_v28 }
  0x44   :  { %446 = vmatpush.msra.mxu0 %v1822_v29 }
  0x45   :  { %466 = vmatpush.msra.mxu1 %v1826_v30 }
  0x46   :  { %447 = vmatpush.msra.mxu0 %v1828_v31 }
  0x47   :  { %467 = vmatpush.msra.mxu1 %v1830_v32 }
  0x86   :  { %v123_v35 = vpop.permute.xlu0 %122 }
  0x87   :  { %v126_v36 = vsel %vm125_vm0, %v1874_v34, %v123_v35 }
  0x88   :  { %1379 = vmatmul.msk.f32.vlgmr.msra.gmra.mxu2 %vm2279_vm1, %v126_v36  ;;  %1380 = vmatmul.msk.f32.vlgmr.msra.gmra.mxu3 %vm2279_vm1, %v126_v36 }
  0x89   :  { %483 = vmatpush.msra.mxu2 %v1739_v1  ;;  %503 = vmatpush.msra.mxu3 %v1741_v2 }
  0x8b   :  { %484 = vmatpush.msra.mxu2 %v1745_v3  ;;  %504 = vmatpush.msra.mxu3 %v1747_v4 }
  0x8d   :  { %485 = vmatpush.msra.mxu2 %v1750_v5  ;;  %505 = vmatpush.msra.mxu3 %v1757_v8 }
  0x8f   :  { %486 = vmatpush.msra.mxu2 %v1764_v10  ;;  %506 = vmatpush.msra.mxu3 %v1769_v12 }
  0x91   :  { %487 = vmatpush.msra.mxu2 %v1778_v15  ;;  %507 = vmatpush.msra.mxu3 %v1783_v17 }
  0x93   :  { %488 = vmatpush.msra.mxu2 %v1790_v19  ;;  %508 = vmatpush.msra.mxu3 %v1793_v20 }
  0x95   :  { %489 = vmatpush.msra.mxu2 %v1798_v21  ;;  %509 = vmatpush.msra.mxu3 %v1801_v22 }
  0x97   :  { %490 = vmatpush.msra.mxu2 %v1810_v25  ;;  %510 = vmatpush.msra.mxu3 %v1814_v26 }
  0xa3   :  { %v148_v38 = vpop.f32.mrf.mxu0 }
  0xa4   :  { %v168_v39 = vpop.f32.mrf.mxu1 }
 0x10b   :  { %v191_v42 = vpop.f32.mrf.mxu2  ;;  %v211_v43 = vpop.f32.mrf.mxu3 }
 0x10c   :  { %v192_v44 = vadd.f32 %v191_v42, %v148_v38  ;;  %v212_v45 = vadd.f32 %v211_v43, %v168_v39 }
 0x10e   :  { %v219_v46 = vadd.f32 %v1906_v40, %v192_v44  ;;  %v220_v47 = vadd.f32 %v1908_v41, %v212_v45 }
 0x110   :  { %v1381_v48 = vmul.f32 -1.442695, %v219_v46  ;;  %v1382_v49 = vmul.f32 -1.442695, %v220_v47 }
 0x112   :  { %1435 = vpow2.f32 %v1381_v48 }
 0x113   :  { %1437 = vpow2.f32 %v1382_v49 }
 0x118   :  { %v1436_v50 = vpop.eup %1435 }
 0x119   :  { %v1438_v51 = vpop.eup %1437  ;;  %v229_v52 = vadd.f32 1.0, %v1436_v50 }
 0x11a   :  { %v230_v53 = vadd.f32 1.0, %v1438_v51  ;;  %v1918_v51 = vld [vmem:[#allocation2 + $0x6] sm:$0x1] }
 0x11b   :  { %1439 = vrcp.f32 %v229_v52  ;;  %v242_v62 = vand.u32 2147483648, %v229_v52  ;;  %v240_v33 = vand.u32 2147483647, %v229_v52  ;;  %vm236_vm4 = vweird.f32 %v229_v52  ;;  %275 = vrot.lane.b32.xlu1 %v1918_v51, %s1698_s2 }
 0x11c   :  { %1441 = vrcp.f32 %v230_v53  ;;  %v257_v35 = vand.u32 2147483648, %v230_v53  ;;  %v255_v37 = vand.u32 2147483647, %v230_v53  ;;  %vm251_vm6 = vweird.f32 %v230_v53 }
 0x11d   :  { %1443 = vtanh.f32 %v220_v47  ;;  %v243_v39 = vor.u32 1.1754944e-38, %v242_v62  ;;  %vm241_vm8 = vcmp.eq.f32.partialorder %v240_v33, 8.507059e+37 }
 0x11e   :  { %v258_v44 = vor.u32 1.1754944e-38, %v257_v35  ;;  %vm256_vm10 = vcmp.eq.f32.partialorder %v255_v37, 8.507059e+37 }
 0x121   :  { %v1440_v55 = vpop.eup %1439 }
 0x122   :  { %v1442_v57 = vpop.eup %1441  ;;  %v232_v58 = vmul.f32 %v1440_v55, %v229_v52  ;;  %vm237_vm2 = vweird.f32 %v1440_v55 }
 0x123   :  { %v247_v59 = vmul.f32 %v1442_v57, %v230_v53  ;;  %vm252_vm3 = vweird.f32 %v1442_v57  ;;  %vm238_vm5 = vmor %vm236_vm4, %vm237_vm2  ;;  %v1444_v45 = vpop.eup %1443 }
 0x124   :  { %v233_v60 = vsub.f32 1.0, %v232_v58  ;;  %vm253_vm9 = vmor %vm251_vm6, %vm252_vm3 }
 0x125   :  { %v248_v63 = vsub.f32 1.0, %v247_v59 }
 0x126   :  { %v234_v0 = vmul.f32 %v1440_v55, %v233_v60 }
 0x127   :  { %v249_v36 = vmul.f32 %v1442_v57, %v248_v63 }
 0x128   :  { %v235_v38 = vadd.f32 %v1440_v55, %v234_v0 }
 0x129   :  { %v250_v42 = vadd.f32 %v1442_v57, %v249_v36 }
 0x12a   :  { %v239_v43 = vsel %vm238_vm5, %v1440_v55, %v235_v38 }
 0x12b   :  { %v244_v46 = vsel %vm241_vm8, %v243_v39, %v239_v43  ;;  %v254_v47 = vsel %vm253_vm9, %v1442_v57, %v250_v42  ;;  %v1929_v57 = vld [vmem:[#allocation2 + $0x1] sm:$0x1] }
 0x12c   :  { %v259_v48 = vsel %vm256_vm10, %v258_v44, %v254_v47  ;;  %v263_v52 = vmul.f32 0.0, %v244_v46 }
 0x12d   :  { %v262_v49 = vsel %vm116_vm7, %v1444_v45, %v259_v48 }
 0x12e   :  { %v264_v50 = vmul.f32 %v262_v49, %v244_v46 }
 0x130   :  { %266 = vrot.lane.b32.xlu0 %v264_v50, %s1700_s3 }
 0x18d   :  { %v276_v58 = vpop.permute.xlu1 %275 }
 0x18e   :  { %v278_v59 = vsel %vm125_vm0, %v1929_v57, %v276_v58 }
 0x18f   :  { %1385 = vmatmul.msk.f32.vlgmr.msrb.gmra.mxu2 %vm2279_vm1, %v278_v59  ;;  %1386 = vmatmul.msk.f32.vlgmr.msrb.gmra.mxu3 %vm2279_vm1, %v278_v59 }
 0x190   :  { %631 = vmatpush.msrb.mxu2 %v1739_v1  ;;  %651 = vmatpush.msrb.mxu3 %v1741_v2 }
 0x192   :  { %632 = vmatpush.msrb.mxu2 %v1745_v3  ;;  %652 = vmatpush.msrb.mxu3 %v1747_v4 }
 0x194   :  { %633 = vmatpush.msrb.mxu2 %v1750_v5  ;;  %653 = vmatpush.msrb.mxu3 %v1757_v8 }
 0x196   :  { %634 = vmatpush.msrb.mxu2 %v1764_v10  ;;  %654 = vmatpush.msrb.mxu3 %v1769_v12 }
 0x198   :  { %635 = vmatpush.msrb.mxu2 %v1778_v15  ;;  %655 = vmatpush.msrb.mxu3 %v1783_v17 }
 0x19a   :  { %636 = vmatpush.msrb.mxu2 %v1790_v19  ;;  %656 = vmatpush.msrb.mxu3 %v1793_v20 }
 0x19c   :  { %637 = vmatpush.msrb.mxu2 %v1798_v21  ;;  %657 = vmatpush.msrb.mxu3 %v1801_v22 }
 0x19e   :  { %638 = vmatpush.msrb.mxu2 %v1810_v25  ;;  %658 = vmatpush.msrb.mxu3 %v1814_v26 }
 0x1a2   :  { %v267_v53 = vpop.permute.xlu0 %266 }
 0x1a3   :  { %v1922_v54 = vadd.f32 %v267_v53, %v263_v52 }
 0x1a5   :  { %1445 = vtanh.f32 %v1922_v54 }
 0x1ab   :  { %v1446_v55 = vpop.eup %1445 }
 0x1ac   :  { %v1925_v56 = vmul.f32 %v1446_v55, %v262_v49 }
 0x1ae   :  { %280 = vrot.lane.b32.xlu1 %v1925_v56, %s1700_s3 }
 0x212   :  { %v344_v62 = vpop.f32.mrf.mxu2  ;;  %v364_v63 = vpop.f32.mrf.mxu3 }
 0x220   :  { %v281_v60 = vpop.permute.xlu1 %280 }
 0x221   :  { %1383 = vmatmul.msk.f32.vlgmr.msrb.gmra.mxu0 %vm2279_vm1, %v281_v60  ;;  %1384 = vmatmul.msk.f32.vlgmr.msrb.gmra.mxu1 %vm2279_vm1, %v281_v60 }
 0x222   :  { %588 = vmatpush.msrb.mxu0 %v1752_v6  ;;  %608 = vmatpush.msrb.mxu1 %v1754_v7 }
 0x224   :  { %589 = vmatpush.msrb.mxu0 %v1760_v9  ;;  %609 = vmatpush.msrb.mxu1 %v1766_v11 }
 0x226   :  { %590 = vmatpush.msrb.mxu0 %v1772_v13  ;;  %610 = vmatpush.msrb.mxu1 %v1774_v14 }
 0x228   :  { %591 = vmatpush.msrb.mxu0 %v1780_v16  ;;  %611 = vmatpush.msrb.mxu1 %v1786_v18 }
 0x22a   :  { %592 = vmatpush.msrb.mxu0 %v1806_v23  ;;  %612 = vmatpush.msrb.mxu1 %v1808_v24 }
 0x22c   :  { %593 = vmatpush.msrb.mxu0 %v1818_v27  ;;  %613 = vmatpush.msrb.mxu1 %v1820_v28 }
 0x22e   :  { %594 = vmatpush.msrb.mxu0 %v1822_v29  ;;  %614 = vmatpush.msrb.mxu1 %v1826_v30 }
 0x230   :  { %595 = vmatpush.msrb.mxu0 %v1828_v31  ;;  %615 = vmatpush.msrb.mxu1 %v1830_v32 }
 0x29e   :  { %v301_v0 = vpop.f32.mrf.mxu0  ;;  %v321_v33 = vpop.f32.mrf.mxu1 }
 0x29f   :  { %v345_v35 = vadd.f32 %v344_v62, %v301_v0  ;;  %v365_v36 = vadd.f32 %v364_v63, %v321_v33 }
 0x2a1   :  { %v367_v37 = vadd.f32 %v345_v35, %v1906_v40  ;;  %v368_v38 = vadd.f32 %v365_v36, %v1908_v41 }
 0x2a3   :  { %v1387_v39 = vmul.f32 -1.442695, %v367_v37  ;;  %v1388_v42 = vmul.f32 -1.442695, %v368_v38 }
 0x2a5   :  { %1447 = vpow2.f32 %v1387_v39 }
 0x2a6   :  { %1449 = vpow2.f32 %v1388_v42 }
 0x2ab   :  { %v1448_v43 = vpop.eup %1447 }
 0x2ac   :  { %v1450_v44 = vpop.eup %1449  ;;  %v377_v45 = vadd.f32 1.0, %v1448_v43 }
 0x2ad   :  { %v378_v46 = vadd.f32 1.0, %v1450_v44 }
 0x2ae   :  { %1451 = vrcp.f32 %v377_v45  ;;  %v390_v53 = vand.u32 2147483648, %v377_v45  ;;  %v388_v59 = vand.u32 2147483647, %v377_v45  ;;  %vm384_vm13 = vweird.f32 %v377_v45 }
 0x2af   :  { %1453 = vrcp.f32 %v378_v46  ;;  %v405_v60 = vand.u32 2147483648, %v378_v46  ;;  %v403_v63 = vand.u32 2147483647, %v378_v46  ;;  %vm399_vm15 = vweird.f32 %v378_v46 }
 0x2b0   :  { %1455 = vtanh.f32 %v368_v38  ;;  %v391_v33 = vor.u32 1.1754944e-38, %v390_v53  ;;  %vm389_vm2 = vcmp.eq.f32.partialorder %v388_v59, 8.507059e+37  ;;  %v1986_v53 = vld [vmem:[#allocation2 + $0x2] sm:$0x1] }
 0x2b1   :  { %v406_v37 = vor.u32 1.1754944e-38, %v405_v60  ;;  %vm404_vm4 = vcmp.eq.f32.partialorder %v403_v63, 8.507059e+37 }
 0x2b4   :  { %v1452_v47 = vpop.eup %1451 }
 0x2b5   :  { %v1454_v48 = vpop.eup %1453  ;;  %v380_v49 = vmul.f32 %v1452_v47, %v377_v45  ;;  %vm385_vm11 = vweird.f32 %v1452_v47  ;;  %v1974_v45 = vld [vmem:[#allocation2 + $0x5] sm:$0x1] }
 0x2b6   :  { %v395_v50 = vmul.f32 %v1454_v48, %v378_v46  ;;  %vm400_vm12 = vweird.f32 %v1454_v48  ;;  %vm386_vm14 = vmor %vm384_vm13, %vm385_vm11  ;;  %v1456_v38 = vpop.eup %1455 }
 0x2b7   :  { %v381_v52 = vsub.f32 1.0, %v380_v49  ;;  %vm401_vm3 = vmor %vm399_vm15, %vm400_vm12  ;;  %vm1317_vm15 = vcmask 1041408  }
 0x2b8   :  { %v396_v55 = vsub.f32 1.0, %v395_v50 }
 0x2b9   :  { %v382_v58 = vmul.f32 %v1452_v47, %v381_v52 }
 0x2ba   :  { %v397_v62 = vmul.f32 %v1454_v48, %v396_v55 }
 0x2bb   :  { %v383_v0 = vadd.f32 %v1452_v47, %v382_v58 }
 0x2bc   :  { %v398_v35 = vadd.f32 %v1454_v48, %v397_v62 }
 0x2bd   :  { %v387_v36 = vsel %vm386_vm14, %v1452_v47, %v383_v0  ;;  %vm1315_vm14 = vcmask 1040384  }
 0x2be   :  { %v392_v39 = vsel %vm389_vm2, %v391_v33, %v387_v36  ;;  %v402_v42 = vsel %vm401_vm3, %v1454_v48, %v398_v35 }
 0x2bf   :  { %v407_v43 = vsel %vm404_vm4, %v406_v37, %v402_v42  ;;  %v411_v46 = vmul.f32 %v392_v39, %v1922_v54 }
 0x2c0   :  { %v410_v44 = vsel %vm116_vm7, %v1456_v38, %v407_v43 }
 0x2c1   :  { %v412_v49 = vmul.f32 %v410_v44, %v392_v39 }
 0x2c3   :  { %414 = vrot.lane.b32.xlu2 %v412_v49, %s1700_s3 }
 0x2cb   :  { %423 = vrot.lane.b32.xlu2 %v1974_v45, %s1698_s2 }
 0x31d   :  { %v415_v47 = vpop.permute.xlu2 %414 }
 0x31e   :  { %v1979_v50 = vadd.f32 %v415_v47, %v411_v46 }
 0x320   :  { %1457 = vtanh.f32 %v1979_v50 }
 0x325   :  { %v424_v55 = vpop.permute.xlu2 %423 }
 0x326   :  { %v1458_v48 = vpop.eup %1457  ;;  %v426_v58 = vsel %vm125_vm0, %v1986_v53, %v424_v55 }
 0x327   :  { %v1982_v52 = vmul.f32 %v1458_v48, %v410_v44  ;;  %1391 = vmatmul.msk.f32.vlgmr.msra.gmra.mxu2 %vm2279_vm1, %v426_v58  ;;  %1392 = vmatmul.msk.f32.vlgmr.msra.gmra.mxu3 %vm2279_vm1, %v426_v58 }
 0x328   :  { %777 = vmatpush.msra.mxu2 %v1739_v1  ;;  %797 = vmatpush.msra.mxu3 %v1741_v2 }
 0x329   :  { %428 = vrot.lane.b32.xlu0 %v1982_v52, %s1700_s3 }
 0x32a   :  { %778 = vmatpush.msra.mxu2 %v1745_v3  ;;  %798 = vmatpush.msra.mxu3 %v1747_v4 }
 0x32c   :  { %779 = vmatpush.msra.mxu2 %v1750_v5  ;;  %799 = vmatpush.msra.mxu3 %v1757_v8 }
 0x32e   :  { %780 = vmatpush.msra.mxu2 %v1764_v10  ;;  %800 = vmatpush.msra.mxu3 %v1769_v12 }
 0x330   :  { %781 = vmatpush.msra.mxu2 %v1778_v15  ;;  %801 = vmatpush.msra.mxu3 %v1783_v17 }
 0x332   :  { %782 = vmatpush.msra.mxu2 %v1790_v19  ;;  %802 = vmatpush.msra.mxu3 %v1793_v20 }
 0x334   :  { %783 = vmatpush.msra.mxu2 %v1798_v21  ;;  %803 = vmatpush.msra.mxu3 %v1801_v22 }
 0x336   :  { %784 = vmatpush.msra.mxu2 %v1810_v25  ;;  %804 = vmatpush.msra.mxu3 %v1814_v26 }
 0x39b   :  { %v429_v54 = vpop.permute.xlu0 %428 }
 0x39c   :  { %1389 = vmatmul.msk.f32.vlgmr.msra.gmra.mxu0 %vm2279_vm1, %v429_v54  ;;  %1390 = vmatmul.msk.f32.vlgmr.msra.gmra.mxu1 %vm2279_vm1, %v429_v54 }
 0x39d   :  { %734 = vmatpush.msra.mxu0 %v1752_v6  ;;  %754 = vmatpush.msra.mxu1 %v1754_v7 }
 0x39f   :  { %735 = vmatpush.msra.mxu0 %v1760_v9  ;;  %755 = vmatpush.msra.mxu1 %v1766_v11 }
 0x3a1   :  { %736 = vmatpush.msra.mxu0 %v1772_v13  ;;  %756 = vmatpush.msra.mxu1 %v1774_v14 }
 0x3a3   :  { %737 = vmatpush.msra.mxu0 %v1780_v16  ;;  %757 = vmatpush.msra.mxu1 %v1786_v18 }
 0x3a5   :  { %738 = vmatpush.msra.mxu0 %v1806_v23  ;;  %758 = vmatpush.msra.mxu1 %v1808_v24 }
 0x3a7   :  { %739 = vmatpush.msra.mxu0 %v1818_v27  ;;  %759 = vmatpush.msra.mxu1 %v1820_v28 }
 0x3a9   :  { %740 = vmatpush.msra.mxu0 %v1822_v29  ;;  %760 = vmatpush.msra.mxu1 %v1826_v30 }
 0x3aa   :  { %v492_v59 = vpop.f32.mrf.mxu2  ;;  %v512_v60 = vpop.f32.mrf.mxu3 }
 0x3ab   :  { %741 = vmatpush.msra.mxu0 %v1828_v31  ;;  %761 = vmatpush.msra.mxu1 %v1830_v32 }
 0x419   :  { %v449_v62 = vpop.f32.mrf.mxu0  ;;  %v469_v63 = vpop.f32.mrf.mxu1 }
 0x41a   :  { %v493_v0 = vadd.f32 %v492_v59, %v449_v62  ;;  %v513_v33 = vadd.f32 %v512_v60, %v469_v63 }
 0x41c   :  { %v515_v35 = vadd.f32 %v493_v0, %v1906_v40  ;;  %v516_v36 = vadd.f32 %v513_v33, %v1908_v41 }
 0x41e   :  { %v1393_v37 = vmul.f32 -1.442695, %v515_v35  ;;  %v1394_v38 = vmul.f32 -1.442695, %v516_v36 }
 0x420   :  { %1459 = vpow2.f32 %v1393_v37 }
 0x421   :  { %1461 = vpow2.f32 %v1394_v38 }
 0x426   :  { %v1460_v39 = vpop.eup %1459 }
 0x427   :  { %v1462_v42 = vpop.eup %1461  ;;  %v525_v43 = vadd.f32 1.0, %v1460_v39 }
 0x428   :  { %v526_v44 = vadd.f32 1.0, %v1462_v42 }
 0x429   :  { %1463 = vrcp.f32 %v525_v43  ;;  %v538_v58 = vand.u32 2147483648, %v525_v43  ;;  %v536_v60 = vand.u32 2147483647, %v525_v43  ;;  %vm532_vm8 = vweird.f32 %v525_v43 }
 0x42a   :  { %1465 = vrcp.f32 %v526_v44  ;;  %v553_v62 = vand.u32 2147483648, %v526_v44  ;;  %v551_v0 = vand.u32 2147483647, %v526_v44  ;;  %vm547_vm10 = vweird.f32 %v526_v44 }
 0x42b   :  { %1467 = vtanh.f32 %v516_v36  ;;  %v539_v35 = vor.u32 1.1754944e-38, %v538_v58  ;;  %vm537_vm11 = vcmp.eq.f32.partialorder %v536_v60, 8.507059e+37  ;;  %v1300_v60 = vrot.slane %v1982_v52, 7 }
 0x42c   :  { %v554_v39 = vor.u32 1.1754944e-38, %v553_v62  ;;  %vm552_vm13 = vcmp.eq.f32.partialorder %v551_v0, 8.507059e+37 }
 0x42f   :  { %v1464_v49 = vpop.eup %1463 }
 0x430   :  { %v1466_v46 = vpop.eup %1465  ;;  %v528_v47 = vmul.f32 %v1464_v49, %v525_v43  ;;  %vm533_vm5 = vweird.f32 %v1464_v49  ;;  %v2031_v43 = vld [vmem:[#allocation2 + $0x4] sm:$0x1] }
 0x431   :  { %v543_v48 = vmul.f32 %v1466_v46, %v526_v44  ;;  %vm548_vm6 = vweird.f32 %v1466_v46  ;;  %vm534_vm9 = vmor %vm532_vm8, %vm533_vm5  ;;  %v1468_v36 = vpop.eup %1467  ;;  %571 = vrot.lane.b32.xlu2 %v2031_v43, %s1698_s2  ;;  %v568_v44 = vld [vmem:[#allocation2 + $0x3] sm:$0x1] }
 0x432   :  { %v529_v55 = vsub.f32 1.0, %v528_v47  ;;  %vm549_vm12 = vmor %vm547_vm10, %vm548_vm6 }
 0x433   :  { %v544_v54 = vsub.f32 1.0, %v543_v48 }
 0x434   :  { %v530_v59 = vmul.f32 %v1464_v49, %v529_v55 }
 0x435   :  { %v545_v63 = vmul.f32 %v1466_v46, %v544_v54 }
 0x436   :  { %v531_v33 = vadd.f32 %v1464_v49, %v530_v59 }
 0x437   :  { %v546_v37 = vadd.f32 %v1466_v46, %v545_v63 }
 0x438   :  { %v535_v38 = vsel %vm534_vm9, %v1464_v49, %v531_v33 }
 0x439   :  { %v540_v42 = vsel %vm537_vm11, %v539_v35, %v535_v38  ;;  %v550_v47 = vsel %vm549_vm12, %v1466_v46, %v546_v37  ;;  %717 = vrot.lane.b32.xlu2 %v568_v44, %s1698_s2  ;;  %vm1319_vm11 = vcmask 1042432  }
 0x43a   :  { %v555_v48 = vsel %vm552_vm13, %v554_v39, %v550_v47  ;;  %v559_v49 = vmul.f32 %v540_v42, %v1979_v50 }
 0x43b   :  { %v558_v55 = vsel %vm116_vm7, %v1468_v36, %v555_v48 }
 0x43c   :  { %v560_v54 = vmul.f32 %v558_v55, %v540_v42 }
 0x43e   :  { %562 = vrot.lane.b32.xlu1 %v560_v54, %s1700_s3 }
 0x441   :  { %863 = vrot.lane.b32.xlu2 %v1986_v53, %s1698_s2  ;;  %v1316_v53 = vsel %vm1315_vm14, %v1925_v56, %v1300_v60 }
 0x449   :  { %1009 = vrot.lane.b32.xlu2 %v1929_v57, %s1698_s2 }
 0x451   :  { %1155 = vrot.lane.b32.xlu2 %v1874_v34, %s1698_s2 }
 0x48b   :  { %v572_v63 = vpop.permute.xlu2 %571 }
 0x48c   :  { %v574_v0 = vsel %vm125_vm0, %v568_v44, %v572_v63 }
 0x48d   :  { %1397 = vmatmul.msk.f32.vlgmr.msrb.gmra.mxu2 %vm2279_vm1, %v574_v0  ;;  %1398 = vmatmul.msk.f32.vlgmr.msrb.gmra.mxu3 %vm2279_vm1, %v574_v0 }
 0x48e   :  { %923 = vmatpush.msrb.mxu2 %v1739_v1  ;;  %943 = vmatpush.msrb.mxu3 %v1741_v2 }
 0x490   :  { %924 = vmatpush.msrb.mxu2 %v1745_v3  ;;  %944 = vmatpush.msrb.mxu3 %v1747_v4 }
 0x492   :  { %925 = vmatpush.msrb.mxu2 %v1750_v5  ;;  %945 = vmatpush.msrb.mxu3 %v1757_v8 }
 0x494   :  { %926 = vmatpush.msrb.mxu2 %v1764_v10  ;;  %946 = vmatpush.msrb.mxu3 %v1769_v12 }
 0x496   :  { %927 = vmatpush.msrb.mxu2 %v1778_v15  ;;  %947 = vmatpush.msrb.mxu3 %v1783_v17 }
 0x498   :  { %928 = vmatpush.msrb.mxu2 %v1790_v19  ;;  %948 = vmatpush.msrb.mxu3 %v1793_v20 }
 0x49a   :  { %929 = vmatpush.msrb.mxu2 %v1798_v21  ;;  %949 = vmatpush.msrb.mxu3 %v1801_v22 }
 0x49c   :  { %930 = vmatpush.msrb.mxu2 %v1810_v25  ;;  %950 = vmatpush.msrb.mxu3 %v1814_v26 }
 0x4b0   :  { %v563_v46 = vpop.permute.xlu1 %562 }
 0x4b1   :  { %v2039_v58 = vadd.f32 %v563_v46, %v559_v49 }
 0x4b3   :  { %1469 = vtanh.f32 %v2039_v58 }
 0x4b9   :  { %v1470_v59 = vpop.eup %1469 }
 0x4ba   :  { %v2045_v62 = vmul.f32 %v1470_v59, %v558_v55 }
 0x4bc   :  { %576 = vrot.lane.b32.xlu0 %v2045_v62, %s1700_s3  ;;  %v1302_v50 = vrot.slane %v2045_v62, 6 }
 0x4be   :  { %v2055_v57 = vsel %vm1317_vm15, %v1316_v53, %v1302_v50 }
 0x510   :  { %v640_v2 = vpop.f32.mrf.mxu2 }
 0x52e   :  { %v577_v1 = vpop.permute.xlu0 %576 }
 0x52f   :  { %1395 = vmatmul.msk.f32.vlgmr.msrb.gmra.mxu0 %vm2279_vm1, %v577_v1  ;;  %1396 = vmatmul.msk.f32.vlgmr.msrb.gmra.mxu1 %vm2279_vm1, %v577_v1 }
 0x530   :  { %880 = vmatpush.msrb.mxu0 %v1752_v6  ;;  %900 = vmatpush.msrb.mxu1 %v1754_v7  ;;  %v660_v6 = vpop.f32.mrf.mxu3 }
 0x532   :  { %881 = vmatpush.msrb.mxu0 %v1760_v9  ;;  %901 = vmatpush.msrb.mxu1 %v1766_v11 }
 0x534   :  { %882 = vmatpush.msrb.mxu0 %v1772_v13  ;;  %902 = vmatpush.msrb.mxu1 %v1774_v14 }
 0x536   :  { %883 = vmatpush.msrb.mxu0 %v1780_v16  ;;  %903 = vmatpush.msrb.mxu1 %v1786_v18 }
 0x538   :  { %884 = vmatpush.msrb.mxu0 %v1806_v23  ;;  %904 = vmatpush.msrb.mxu1 %v1808_v24 }
 0x53a   :  { %885 = vmatpush.msrb.mxu0 %v1818_v27  ;;  %905 = vmatpush.msrb.mxu1 %v1820_v28 }
 0x53c   :  { %886 = vmatpush.msrb.mxu0 %v1822_v29  ;;  %906 = vmatpush.msrb.mxu1 %v1826_v30 }
 0x53e   :  { %887 = vmatpush.msrb.mxu0 %v1828_v31  ;;  %907 = vmatpush.msrb.mxu1 %v1830_v32 }
 0x5ac   :  { %v597_v7 = vpop.f32.mrf.mxu0  ;;  %v617_v9 = vpop.f32.mrf.mxu1 }
 0x5ad   :  { %v641_v11 = vadd.f32 %v640_v2, %v597_v7  ;;  %v661_v13 = vadd.f32 %v660_v6, %v617_v9 }
 0x5af   :  { %v663_v14 = vadd.f32 %v641_v11, %v1906_v40  ;;  %v664_v16 = vadd.f32 %v661_v13, %v1908_v41 }
 0x5b1   :  { %v1399_v18 = vmul.f32 -1.442695, %v663_v14  ;;  %v1400_v34 = vmul.f32 -1.442695, %v664_v16  ;;  %v718_v14 = vpop.permute.xlu2 %717 }
 0x5b3   :  { %1471 = vpow2.f32 %v1399_v18  ;;  %v2103_v18 = vld [vmem:[#allocation5 + $0x70] sm:$0xff] }
 0x5b4   :  { %1473 = vpow2.f32 %v1400_v34  ;;  %v2106_v34 = vld [vmem:[#allocation5 + $0x78] sm:$0xff] }
 0x5b9   :  { %v1472_v33 = vpop.eup %1471 }
 0x5ba   :  { %v1474_v35 = vpop.eup %1473  ;;  %v673_v37 = vadd.f32 1.0, %v1472_v33 }
 0x5bb   :  { %v674_v38 = vadd.f32 1.0, %v1474_v35 }
 0x5bc   :  { %1475 = vrcp.f32 %v673_v37  ;;  %v686_v55 = vand.u32 2147483648, %v673_v37  ;;  %v684_v49 = vand.u32 2147483647, %v673_v37  ;;  %vm680_vm4 = vweird.f32 %v673_v37 }
 0x5bd   :  { %1477 = vrcp.f32 %v674_v38  ;;  %v701_v46 = vand.u32 2147483648, %v674_v38  ;;  %v699_v60 = vand.u32 2147483647, %v674_v38  ;;  %vm695_vm6 = vweird.f32 %v674_v38 }
 0x5be   :  { %1479 = vtanh.f32 %v664_v16  ;;  %v687_v53 = vor.u32 1.1754944e-38, %v686_v55  ;;  %vm685_vm8 = vcmp.eq.f32.partialorder %v684_v49, 8.507059e+37  ;;  %v720_v16 = vsel %vm125_vm0, %v2031_v43, %v718_v14  ;;  %v2156_v43 = vld [vmem:[#allocation7 + $0x40] sm:$0xff] }
 0x5bf   :  { %v702_v1 = vor.u32 1.1754944e-38, %v701_v46  ;;  %vm700_vm10 = vcmp.eq.f32.partialorder %v699_v60, 8.507059e+37  ;;  %1403 = vmatmul.msk.f32.vlgmr.msra.gmra.mxu2 %vm2279_vm1, %v720_v16  ;;  %1404 = vmatmul.msk.f32.vlgmr.msra.gmra.mxu3 %vm2279_vm1, %v720_v16  ;;  %v864_v16 = vpop.permute.xlu2 %863 }
 0x5c0   :  { %1069 = vmatpush.msra.mxu2 %v2103_v18  ;;  %1089 = vmatpush.msra.mxu3 %v2106_v34 }
 0x5c2   :  { %v1476_v39 = vpop.eup %1475  ;;  %1070 = vmatpush.msra.mxu2 %v1745_v3  ;;  %1090 = vmatpush.msra.mxu3 %v1747_v4 }
 0x5c3   :  { %v1478_v36 = vpop.eup %1477  ;;  %v676_v42 = vmul.f32 %v1476_v39, %v673_v37  ;;  %vm681_vm2 = vweird.f32 %v1476_v39 }
 0x5c4   :  { %v691_v47 = vmul.f32 %v1478_v36, %v674_v38  ;;  %vm696_vm3 = vweird.f32 %v1478_v36  ;;  %vm682_vm5 = vmor %vm680_vm4, %vm681_vm2  ;;  %v1480_v2 = vpop.eup %1479  ;;  %1071 = vmatpush.msra.mxu2 %v1750_v5  ;;  %1091 = vmatpush.msra.mxu3 %v1757_v8 }
 0x5c5   :  { %v677_v48 = vsub.f32 1.0, %v676_v42  ;;  %vm697_vm9 = vmor %vm695_vm6, %vm696_vm3 }
 0x5c6   :  { %v692_v54 = vsub.f32 1.0, %v691_v47  ;;  %1072 = vmatpush.msra.mxu2 %v1764_v10  ;;  %1092 = vmatpush.msra.mxu3 %v1769_v12 }
 0x5c7   :  { %v678_v44 = vmul.f32 %v1476_v39, %v677_v48 }
 0x5c8   :  { %v693_v59 = vmul.f32 %v1478_v36, %v692_v54  ;;  %1073 = vmatpush.msra.mxu2 %v1778_v15  ;;  %1093 = vmatpush.msra.mxu3 %v1783_v17 }
 0x5c9   :  { %v679_v50 = vadd.f32 %v1476_v39, %v678_v44 }
 0x5ca   :  { %v694_v63 = vadd.f32 %v1478_v36, %v693_v59  ;;  %1074 = vmatpush.msra.mxu2 %v1790_v19  ;;  %1094 = vmatpush.msra.mxu3 %v1793_v20  ;;  %v2138_v19 = vld [vmem:[#allocation7 + $0x70] sm:$0xff]  ;;  %v2141_v20 = vld [vmem:[#allocation7 + $0x78] sm:$0xff] }
 0x5cb   :  { %v683_v0 = vsel %vm682_vm5, %v1476_v39, %v679_v50 }
 0x5cc   :  { %v688_v6 = vsel %vm685_vm8, %v687_v53, %v683_v0  ;;  %v698_v7 = vsel %vm697_vm9, %v1478_v36, %v694_v63  ;;  %1075 = vmatpush.msra.mxu2 %v1798_v21  ;;  %1095 = vmatpush.msra.mxu3 %v1801_v22  ;;  %v2144_v21 = vld [vmem:[#allocation7 + $0x60] sm:$0xff]  ;;  %v2147_v22 = vld [vmem:[#allocation7 + $0x68] sm:$0xff]  ;;  %vm1321_vm9 = vcmask 1043456  }
 0x5cd   :  { %v703_v9 = vsel %vm700_vm10, %v702_v1, %v698_v7  ;;  %v707_v3 = vmul.f32 %v688_v6, %v2039_v58  ;;  %v2159_v58 = vld [vmem:[#allocation7 + $0x48] sm:$0xff] }
 0x5ce   :  { %v706_v11 = vsel %vm116_vm7, %v1480_v2, %v703_v9  ;;  %1076 = vmatpush.msra.mxu2 %v1810_v25  ;;  %1096 = vmatpush.msra.mxu3 %v1814_v26  ;;  %v2150_v25 = vld [vmem:[#allocation7 + $0x50] sm:$0xff]  ;;  %v2153_v26 = vld [vmem:[#allocation7 + $0x58] sm:$0xff] }
 0x5cf   :  { %v708_v13 = vmul.f32 %v706_v11, %v688_v6 }
 0x5d1   :  { %710 = vrot.lane.b32.xlu1 %v708_v13, %s1700_s3 }
 0x642   :  { %v806_v33 = vpop.f32.mrf.mxu3 }
 0x643   :  { %v711_v4 = vpop.permute.xlu1 %710 }
 0x644   :  { %v2124_v5 = vadd.f32 %v711_v4, %v707_v3  ;;  %v866_v3 = vsel %vm125_vm0, %v1974_v45, %v864_v16  ;;  %v1541_v4 = vld [vmem:[#allocation5 + $0x60] sm:$0xff]  ;;  %v1547_v45 = vld [vmem:[#allocation5 + $0x30] sm:$0xff] }
 0x645   :  { %1409 = vmatmul.msk.f32.vlgmr.msrb.gmra.mxu2 %vm2279_vm1, %v866_v3  ;;  %1410 = vmatmul.msk.f32.vlgmr.msrb.gmra.mxu3 %vm2279_vm1, %v866_v3 }
 0x646   :  { %1481 = vtanh.f32 %v2124_v5  ;;  %1215 = vmatpush.msrb.mxu2 %v2103_v18  ;;  %1235 = vmatpush.msrb.mxu3 %v2106_v34  ;;  %v1550_v18 = vld [vmem:[#allocation5 + $0x28] sm:$0xff]  ;;  %v1551_v34 = vld [vmem:[#allocation5 + $0x10] sm:$0xff] }
 0x648   :  { %1216 = vmatpush.msrb.mxu2 %v1541_v4 }
 0x64c   :  { %v1482_v8 = vpop.eup %1481 }
 0x64d   :  { %v2127_v10 = vmul.f32 %v1482_v8, %v706_v11  ;;  %v1542_v8 = vld [vmem:[#allocation5 + $0x68] sm:$0xff] }
 0x64e   :  { %1236 = vmatpush.msrb.mxu3 %v1542_v8 }
 0x64f   :  { %722 = vrot.lane.b32.xlu0 %v2127_v10, %s1700_s3  ;;  %v1304_v12 = vrot.slane %v2127_v10, 5 }
 0x651   :  { %v2134_v15 = vsel %vm1319_vm11, %v2055_v57, %v1304_v12  ;;  %v786_v57 = vpop.f32.mrf.mxu2  ;;  %v1543_v12 = vld [vmem:[#allocation5 + $0x50] sm:$0xff] }
 0x652   :  { %1217 = vmatpush.msrb.mxu2 %v1543_v12 }
 0x6c1   :  { %v723_v17 = vpop.permute.xlu0 %722 }
 0x6c2   :  { %1401 = vmatmul.msk.f32.vlgmr.msra.gmra.mxu0 %vm2279_vm1, %v723_v17  ;;  %1402 = vmatmul.msk.f32.vlgmr.msra.gmra.mxu1 %vm2279_vm1, %v723_v17  ;;  %v1544_v17 = vld [vmem:[#allocation5 + $0x58] sm:$0xff] }
 0x6c3   :  { %1026 = vmatpush.msra.mxu0 %v2138_v19  ;;  %1046 = vmatpush.msra.mxu1 %v2141_v20 }
 0x6c4   :  { %1237 = vmatpush.msrb.mxu3 %v1544_v17 }
 0x6c5   :  { %1027 = vmatpush.msra.mxu0 %v2144_v21  ;;  %1047 = vmatpush.msra.mxu1 %v2147_v22 }
 0x6c7   :  { %1028 = vmatpush.msra.mxu0 %v2150_v25  ;;  %1048 = vmatpush.msra.mxu1 %v2153_v26 }
 0x6c9   :  { %1029 = vmatpush.msra.mxu0 %v2156_v43  ;;  %1049 = vmatpush.msra.mxu1 %v2159_v58 }
 0x6cb   :  { %1030 = vmatpush.msra.mxu0 %v1806_v23  ;;  %1050 = vmatpush.msra.mxu1 %v1808_v24 }
 0x6cd   :  { %1031 = vmatpush.msra.mxu0 %v1818_v27  ;;  %1051 = vmatpush.msra.mxu1 %v1820_v28 }
 0x6cf   :  { %1032 = vmatpush.msra.mxu0 %v1822_v29  ;;  %1052 = vmatpush.msra.mxu1 %v1826_v30 }
 0x6d1   :  { %1033 = vmatpush.msra.mxu0 %v1828_v31  ;;  %1053 = vmatpush.msra.mxu1 %v1830_v32 }
 0x73f   :  { %v743_v35 = vpop.f32.mrf.mxu0  ;;  %v763_v37 = vpop.f32.mrf.mxu1 }
 0x740   :  { %v787_v38 = vadd.f32 %v786_v57, %v743_v35  ;;  %v807_v23 = vadd.f32 %v806_v33, %v763_v37  ;;  %v1545_v57 = vld [vmem:[#allocation5 + $0x40] sm:$0xff]  ;;  %v1546_v33 = vld [vmem:[#allocation5 + $0x48] sm:$0xff]  ;;  %v1548_v35 = vld [vmem:[#allocation5 + $0x38] sm:$0xff] }
 0x741   :  { %1218 = vmatpush.msrb.mxu2 %v1545_v57  ;;  %1238 = vmatpush.msrb.mxu3 %v1546_v33  ;;  %v1549_v37 = vld [vmem:[#allocation5 + $0x20] sm:$0xff] }
 0x742   :  { %v809_v24 = vadd.f32 %v787_v38, %v1906_v40  ;;  %v810_v27 = vadd.f32 %v807_v23, %v1908_v41  ;;  %v1552_v38 = vld [vmem:[#allocation5 + $0x18] sm:$0xff]  ;;  %v1553_v23 = vld [vmem:[#allocation5] sm:$0xff] }
 0x743   :  { %1219 = vmatpush.msrb.mxu2 %v1547_v45  ;;  %1239 = vmatpush.msrb.mxu3 %v1548_v35 }
 0x744   :  { %v1405_v39 = vmul.f32 -1.442695, %v809_v24  ;;  %v1406_v28 = vmul.f32 -1.442695, %v810_v27  ;;  %v1554_v24 = vld [vmem:[#allocation5 + $0x8] sm:$0xff] }
 0x745   :  { %1220 = vmatpush.msrb.mxu2 %v1549_v37  ;;  %1240 = vmatpush.msrb.mxu3 %v1550_v18 }
 0x746   :  { %1483 = vpow2.f32 %v1405_v39 }
 0x747   :  { %1485 = vpow2.f32 %v1406_v28  ;;  %1221 = vmatpush.msrb.mxu2 %v1551_v34  ;;  %1241 = vmatpush.msrb.mxu3 %v1552_v38  ;;  %v1010_v38 = vpop.permute.xlu2 %1009 }
 0x749   :  { %1222 = vmatpush.msrb.mxu2 %v1553_v23  ;;  %1242 = vmatpush.msrb.mxu3 %v1554_v24  ;;  %v1012_v23 = vsel %vm125_vm0, %v1918_v51, %v1010_v38 }
 0x74a   :  { %1415 = vmatmul.msk.f32.vlgmr.msra.gmra.mxu2 %vm2279_vm1, %v1012_v23  ;;  %1416 = vmatmul.msk.f32.vlgmr.msra.gmra.mxu3 %vm2279_vm1, %v1012_v23 }
 0x74c   :  { %v1484_v29 = vpop.eup %1483 }
 0x74d   :  { %v1486_v30 = vpop.eup %1485  ;;  %v819_v36 = vadd.f32 1.0, %v1484_v29 }
 0x74e   :  { %v820_v31 = vadd.f32 1.0, %v1486_v30 }
 0x74f   :  { %1487 = vrcp.f32 %v819_v36  ;;  %v832_v54 = vand.u32 2147483648, %v819_v36  ;;  %v830_v46 = vand.u32 2147483647, %v819_v36  ;;  %vm826_vm2 = vweird.f32 %v819_v36 }
 0x750   :  { %1489 = vrcp.f32 %v820_v31  ;;  %v847_v59 = vand.u32 2147483648, %v820_v31  ;;  %v845_v50 = vand.u32 2147483647, %v820_v31  ;;  %vm841_vm4 = vweird.f32 %v820_v31 }
 0x751   :  { %1491 = vtanh.f32 %v810_v27  ;;  %v833_v63 = vor.u32 1.1754944e-38, %v832_v54  ;;  %vm831_vm5 = vcmp.eq.f32.partialorder %v830_v46, 8.507059e+37 }
 0x752   :  { %v848_v2 = vor.u32 1.1754944e-38, %v847_v59  ;;  %vm846_vm8 = vcmp.eq.f32.partialorder %v845_v50, 8.507059e+37 }
 0x755   :  { %v1488_v32 = vpop.eup %1487 }
 0x756   :  { %v1490_v42 = vpop.eup %1489  ;;  %v822_v47 = vmul.f32 %v1488_v32, %v819_v36  ;;  %vm827_vm12 = vweird.f32 %v1488_v32 }
 0x757   :  { %v837_v48 = vmul.f32 %v1490_v42, %v820_v31  ;;  %vm842_vm13 = vweird.f32 %v1490_v42  ;;  %vm828_vm3 = vmor %vm826_vm2, %vm827_vm12  ;;  %v1492_v6 = vpop.eup %1491 }
 0x758   :  { %v823_v55 = vsub.f32 1.0, %v822_v47  ;;  %vm843_vm6 = vmor %vm841_vm4, %vm842_vm13 }
 0x759   :  { %v838_v44 = vsub.f32 1.0, %v837_v48 }
 0x75a   :  { %v824_v49 = vmul.f32 %v1488_v32, %v823_v55 }
 0x75b   :  { %v839_v60 = vmul.f32 %v1490_v42, %v838_v44 }
 0x75c   :  { %v825_v53 = vadd.f32 %v1488_v32, %v824_v49 }
 0x75d   :  { %v840_v0 = vadd.f32 %v1490_v42, %v839_v60 }
 0x75e   :  { %v829_v1 = vsel %vm828_vm3, %v1488_v32, %v825_v53 }
 0x75f   :  { %v834_v7 = vsel %vm831_vm5, %v833_v63, %v829_v1  ;;  %v844_v9 = vsel %vm843_vm6, %v1490_v42, %v840_v0  ;;  %v1557_v42 = vld [vmem:[#allocation7 + $0x20] sm:$0xff] }
 0x760   :  { %v849_v11 = vsel %vm846_vm8, %v848_v2, %v844_v9  ;;  %v853_v27 = vmul.f32 %v834_v7, %v2124_v5  ;;  %v1555_v5 = vld [vmem:[#allocation7 + $0x30] sm:$0xff]  ;;  %vm1323_vm8 = vcmask 1044480  }
 0x761   :  { %v852_v13 = vsel %vm116_vm7, %v1492_v6, %v849_v11 }
 0x762   :  { %v854_v14 = vmul.f32 %v852_v13, %v834_v7 }
 0x764   :  { %856 = vrot.lane.b32.xlu1 %v854_v14, %s1700_s3 }
 0x7d6   :  { %v857_v39 = vpop.permute.xlu1 %856 }
 0x7d7   :  { %v2182_v28 = vadd.f32 %v857_v39, %v853_v27 }
 0x7d9   :  { %1493 = vtanh.f32 %v2182_v28 }
 0x7df   :  { %v1494_v29 = vpop.eup %1493 }
 0x7e0   :  { %v2185_v30 = vmul.f32 %v1494_v29, %v852_v13 }
 0x7e2   :  { %868 = vrot.lane.b32.xlu0 %v2185_v30, %s1700_s3  ;;  %v1306_v36 = vrot.slane %v2185_v30, 4 }
 0x7e4   :  { %v2192_v31 = vsel %vm1321_vm9, %v2134_v15, %v1306_v36  ;;  %v1556_v15 = vld [vmem:[#allocation7 + $0x38] sm:$0xff] }
 0x854   :  { %v869_v32 = vpop.permute.xlu0 %868 }
 0x855   :  { %1407 = vmatmul.msk.f32.vlgmr.msrb.gmra.mxu0 %vm2279_vm1, %v869_v32  ;;  %1408 = vmatmul.msk.f32.vlgmr.msrb.gmra.mxu1 %vm2279_vm1, %v869_v32 }
 0x856   :  { %1172 = vmatpush.msrb.mxu0 %v2138_v19  ;;  %1192 = vmatpush.msrb.mxu1 %v2141_v20  ;;  %v1558_v19 = vld [vmem:[#allocation7 + $0x28] sm:$0xff]  ;;  %v1559_v20 = vld [vmem:[#allocation7 + $0x10] sm:$0xff] }
 0x858   :  { %1173 = vmatpush.msrb.mxu0 %v2144_v21  ;;  %1193 = vmatpush.msrb.mxu1 %v2147_v22  ;;  %v1560_v21 = vld [vmem:[#allocation7 + $0x18] sm:$0xff]  ;;  %v1561_v22 = vld [vmem:[#allocation7] sm:$0xff] }
 0x85a   :  { %1174 = vmatpush.msrb.mxu0 %v2150_v25  ;;  %1194 = vmatpush.msrb.mxu1 %v2153_v26  ;;  %v1562_v25 = vld [vmem:[#allocation7 + $0x8] sm:$0xff]  ;;  %v932_v26 = vpop.f32.mrf.mxu2 }
 0x85c   :  { %1175 = vmatpush.msrb.mxu0 %v2156_v43  ;;  %1195 = vmatpush.msrb.mxu1 %v2159_v58  ;;  %v952_v43 = vpop.f32.mrf.mxu3 }
 0x85e   :  { %1176 = vmatpush.msrb.mxu0 %v1555_v5  ;;  %1196 = vmatpush.msrb.mxu1 %v1556_v15 }
 0x860   :  { %1177 = vmatpush.msrb.mxu0 %v1557_v42  ;;  %1197 = vmatpush.msrb.mxu1 %v1558_v19 }
 0x862   :  { %1178 = vmatpush.msrb.mxu0 %v1559_v20  ;;  %1198 = vmatpush.msrb.mxu1 %v1560_v21 }
 0x864   :  { %1179 = vmatpush.msrb.mxu0 %v1561_v22  ;;  %1199 = vmatpush.msrb.mxu1 %v1562_v25  ;;  %v1098_v15 = vpop.f32.mrf.mxu3 }
 0x8d2   :  { %v889_v47 = vpop.f32.mrf.mxu0  ;;  %v909_v58 = vpop.f32.mrf.mxu1 }
 0x8d3   :  { %v933_v48 = vadd.f32 %v932_v26, %v889_v47  ;;  %v953_v55 = vadd.f32 %v952_v43, %v909_v58 }
 0x8d5   :  { %v955_v54 = vadd.f32 %v933_v48, %v1906_v40  ;;  %v956_v44 = vadd.f32 %v953_v55, %v1908_v41 }
 0x8d7   :  { %v1411_v49 = vmul.f32 -1.442695, %v955_v54  ;;  %v1412_v46 = vmul.f32 -1.442695, %v956_v44 }
 0x8d9   :  { %1495 = vpow2.f32 %v1411_v49 }
 0x8da   :  { %1497 = vpow2.f32 %v1412_v46 }
 0x8df   :  { %v1496_v59 = vpop.eup %1495 }
 0x8e0   :  { %v1498_v60 = vpop.eup %1497  ;;  %v965_v50 = vadd.f32 1.0, %v1496_v59 }
 0x8e1   :  { %v966_v53 = vadd.f32 1.0, %v1498_v60 }
 0x8e2   :  { %1499 = vrcp.f32 %v965_v50  ;;  %v978_v7 = vand.u32 2147483648, %v965_v50  ;;  %v976_v13 = vand.u32 2147483647, %v965_v50  ;;  %vm972_vm13 = vweird.f32 %v965_v50 }
 0x8e3   :  { %1501 = vrcp.f32 %v966_v53  ;;  %v993_v14 = vand.u32 2147483648, %v966_v53  ;;  %v991_v3 = vand.u32 2147483647, %v966_v53  ;;  %vm987_vm3 = vweird.f32 %v966_v53 }
 0x8e4   :  { %1503 = vtanh.f32 %v956_v44  ;;  %v979_v8 = vor.u32 1.1754944e-38, %v978_v7  ;;  %vm977_vm4 = vcmp.eq.f32.partialorder %v976_v13, 8.507059e+37 }
 0x8e5   :  { %v994_v57 = vor.u32 1.1754944e-38, %v993_v14  ;;  %vm992_vm6 = vcmp.eq.f32.partialorder %v991_v3, 8.507059e+37 }
 0x8e8   :  { %v1500_v63 = vpop.eup %1499 }
 0x8e9   :  { %v1502_v0 = vpop.eup %1501  ;;  %v968_v1 = vmul.f32 %v1500_v63, %v965_v50  ;;  %vm973_vm10 = vweird.f32 %v1500_v63 }
 0x8ea   :  { %v983_v2 = vmul.f32 %v1502_v0, %v966_v53  ;;  %vm988_vm12 = vweird.f32 %v1502_v0  ;;  %vm974_vm2 = vmor %vm972_vm13, %vm973_vm10  ;;  %v1504_v33 = vpop.eup %1503 }
 0x8eb   :  { %v969_v6 = vsub.f32 1.0, %v968_v1  ;;  %vm989_vm5 = vmor %vm987_vm3, %vm988_vm12 }
 0x8ec   :  { %v984_v9 = vsub.f32 1.0, %v983_v2 }
 0x8ed   :  { %v970_v11 = vmul.f32 %v1500_v63, %v969_v6 }
 0x8ee   :  { %v985_v16 = vmul.f32 %v1502_v0, %v984_v9 }
 0x8ef   :  { %v971_v4 = vadd.f32 %v1500_v63, %v970_v11 }
 0x8f0   :  { %v986_v12 = vadd.f32 %v1502_v0, %v985_v16 }
 0x8f1   :  { %v975_v17 = vsel %vm974_vm2, %v1500_v63, %v971_v4 }
 0x8f2   :  { %v980_v45 = vsel %vm977_vm4, %v979_v8, %v975_v17  ;;  %v990_v35 = vsel %vm989_vm5, %v1502_v0, %v986_v12  ;;  %v1156_v12 = vpop.permute.xlu2 %1155  ;;  %v1563_v17 = vld [vmem:[#allocation2 + $0x7] sm:$0x1] }
 0x8f3   :  { %v995_v37 = vsel %vm992_vm6, %v994_v57, %v990_v35  ;;  %v999_v24 = vmul.f32 %v980_v45, %v2182_v28  ;;  %v1078_v28 = vpop.f32.mrf.mxu2  ;;  %v1158_v57 = vsel %vm125_vm0, %v1563_v17, %v1156_v12  ;;  %v1335_v12 = vrot.slane %v2127_v10, 4 }
 0x8f4   :  { %v998_v18 = vsel %vm116_vm7, %v1504_v33, %v995_v37  ;;  %1421 = vmatmul.msk.f32.vlgmr.msrb.gmra.mxu2 %vm2279_vm1, %v1158_v57  ;;  %1422 = vmatmul.msk.f32.vlgmr.msrb.gmra.mxu3 %vm2279_vm1, %v1158_v57  ;;  %v1337_v57 = vrot.slane %v2045_v62, 3 }
 0x8f5   :  { %v1000_v34 = vmul.f32 %v998_v18, %v980_v45 }
 0x8f7   :  { %1002 = vrot.lane.b32.xlu1 %v1000_v34, %s1700_s3 }
 0x969   :  { %v1003_v27 = vpop.permute.xlu1 %1002 }
 0x96a   :  { %v2214_v39 = vadd.f32 %v1003_v27, %v999_v24 }
 0x96c   :  { %1505 = vtanh.f32 %v2214_v39 }
 0x972   :  { %v1506_v29 = vpop.eup %1505 }
 0x973   :  { %v2217_v36 = vmul.f32 %v1506_v29, %v998_v18 }
 0x975   :  { %1014 = vrot.lane.b32.xlu0 %v2217_v36, %s1700_s3  ;;  %v1308_v51 = vrot.slane %v2217_v36, 3 }
 0x977   :  { %v2224_v32 = vsel %vm1323_vm8, %v2192_v31, %v1308_v51  ;;  %v1224_v24 = vpop.f32.mrf.mxu2  ;;  %v1244_v27 = vpop.f32.mrf.mxu3 }
 0x9e7   :  { %v1015_v5 = vpop.permute.xlu0 %1014 }
 0x9e8   :  { %1413 = vmatmul.msk.f32.vlgmr.msra.gmra.mxu0 %vm2279_vm1, %v1015_v5  ;;  %1414 = vmatmul.msk.f32.vlgmr.msra.gmra.mxu1 %vm2279_vm1, %v1015_v5 }
 0xa65   :  { %v1035_v42 = vpop.f32.mrf.mxu0  ;;  %v1055_v19 = vpop.f32.mrf.mxu1 }
 0xa66   :  { %v1079_v20 = vadd.f32 %v1078_v28, %v1035_v42  ;;  %v1099_v21 = vadd.f32 %v1098_v15, %v1055_v19 }
 0xa68   :  { %v1101_v22 = vadd.f32 %v1079_v20, %v1906_v40  ;;  %v1102_v25 = vadd.f32 %v1099_v21, %v1908_v41 }
 0xa6a   :  { %v1417_v26 = vmul.f32 -1.442695, %v1101_v22  ;;  %v1418_v43 = vmul.f32 -1.442695, %v1102_v25 }
 0xa6c   :  { %1507 = vpow2.f32 %v1417_v26 }
 0xa6d   :  { %1509 = vpow2.f32 %v1418_v43 }
 0xa72   :  { %v1508_v31 = vpop.eup %1507 }
 0xa73   :  { %v1510_v47 = vpop.eup %1509  ;;  %v1111_v58 = vadd.f32 1.0, %v1508_v31 }
 0xa74   :  { %v1112_v48 = vadd.f32 1.0, %v1510_v47 }
 0xa75   :  { %1511 = vrcp.f32 %v1111_v58  ;;  %v1124_v59 = vand.u32 2147483648, %v1111_v58  ;;  %v1122_v53 = vand.u32 2147483647, %v1111_v58  ;;  %vm1118_vm13 = vweird.f32 %v1111_v58 }
 0xa76   :  { %1513 = vrcp.f32 %v1112_v48  ;;  %v1139_v63 = vand.u32 2147483648, %v1112_v48  ;;  %v1137_v1 = vand.u32 2147483647, %v1112_v48  ;;  %vm1133_vm3 = vweird.f32 %v1112_v48 }
 0xa77   :  { %1515 = vtanh.f32 %v1102_v25  ;;  %v1125_v6 = vor.u32 1.1754944e-38, %v1124_v59  ;;  %vm1123_vm4 = vcmp.eq.f32.partialorder %v1122_v53, 8.507059e+37 }
 0xa78   :  { %v1140_v11 = vor.u32 1.1754944e-38, %v1139_v63  ;;  %vm1138_vm6 = vcmp.eq.f32.partialorder %v1137_v1, 8.507059e+37 }
 0xa7b   :  { %v1512_v55 = vpop.eup %1511 }
 0xa7c   :  { %v1514_v54 = vpop.eup %1513  ;;  %v1114_v44 = vmul.f32 %v1512_v55, %v1111_v58  ;;  %vm1119_vm10 = vweird.f32 %v1512_v55 }
 0xa7d   :  { %v1129_v49 = vmul.f32 %v1514_v54, %v1112_v48  ;;  %vm1134_vm12 = vweird.f32 %v1514_v54  ;;  %vm1120_vm2 = vmor %vm1118_vm13, %vm1119_vm10  ;;  %v1516_v13 = vpop.eup %1515  ;;  %vm1325_vm10 = vcmask 1045504  }
 0xa7e   :  { %v1115_v46 = vsub.f32 1.0, %v1114_v44  ;;  %vm1135_vm5 = vmor %vm1133_vm3, %vm1134_vm12 }
 0xa7f   :  { %v1130_v60 = vsub.f32 1.0, %v1129_v49 }
 0xa80   :  { %v1116_v50 = vmul.f32 %v1512_v55, %v1115_v46 }
 0xa81   :  { %v1131_v0 = vmul.f32 %v1514_v54, %v1130_v60 }
 0xa82   :  { %v1117_v2 = vadd.f32 %v1512_v55, %v1116_v50 }
 0xa83   :  { %v1132_v7 = vadd.f32 %v1514_v54, %v1131_v0 }
 0xa84   :  { %v1121_v9 = vsel %vm1120_vm2, %v1512_v55, %v1117_v2 }
 0xa85   :  { %v1126_v14 = vsel %vm1123_vm4, %v1125_v6, %v1121_v9  ;;  %v1136_v16 = vsel %vm1135_vm5, %v1514_v54, %v1132_v7 }
 0xa86   :  { %v1141_v3 = vsel %vm1138_vm6, %v1140_v11, %v1136_v16  ;;  %v1145_v33 = vmul.f32 %v1126_v14, %v2214_v39 }
 0xa87   :  { %v1144_v4 = vsel %vm116_vm7, %v1516_v13, %v1141_v3  ;;  %v1331_v3 = vrot.slane %v2217_v36, 6  ;;  %v1339_v36 = vrot.slane %v1982_v52, 2 }
 0xa88   :  { %v1146_v8 = vmul.f32 %v1144_v4, %v1126_v14 }
 0xa8a   :  { %1148 = vrot.lane.b32.xlu1 %v1146_v8, %s1700_s3 }
 0xafc   :  { %v1149_v45 = vpop.permute.xlu1 %1148 }
 0xafd   :  { %v1151_v35 = vadd.f32 %v1149_v45, %v1145_v33 }
 0xaff   :  { %1517 = vtanh.f32 %v1151_v35 }
 0xb05   :  { %v1518_v37 = vpop.eup %1517 }
 0xb06   :  { %v2237_v18 = vmul.f32 %v1518_v37, %v1144_v4  ;;  %v1333_v4 = vrot.slane %v2185_v30, 5  ;;  %v1341_v30 = vrot.slane %v1925_v56, 1 }
 0xb08   :  { %1160 = vrot.lane.b32.xlu0 %v2237_v18, %s1700_s3  ;;  %v1310_v34 = vrot.slane %v2237_v18, 2  ;;  %v1329_v14 = vrot.slane %v2237_v18, 7 }
 0xb0a   :  { %v2244_v38 = vsel %vm1325_vm10, %v2224_v32, %v1310_v34 }
 0xb7a   :  { %v1161_v23 = vpop.permute.xlu0 %1160 }
 0xb7b   :  { %1419 = vmatmul.msk.f32.vlgmr.msrb.gmra.mxu0 %vm2279_vm1, %v1161_v23  ;;  %1420 = vmatmul.msk.f32.vlgmr.msrb.gmra.mxu1 %vm2279_vm1, %v1161_v23 }
 0xbf8   :  { %v1181_v39 = vpop.f32.mrf.mxu0  ;;  %v1201_v29 = vpop.f32.mrf.mxu1 }
 0xbf9   :  { %v1225_v51 = vadd.f32 %v1224_v24, %v1181_v39  ;;  %v1245_v5 = vadd.f32 %v1244_v27, %v1201_v29 }
 0xbfb   :  { %v1247_v28 = vadd.f32 %v1225_v51, %v1906_v40  ;;  %v1248_v15 = vadd.f32 %v1245_v5, %v1908_v41 }
 0xbfd   :  { %v1423_v42 = vmul.f32 -1.442695, %v1247_v28  ;;  %v1424_v19 = vmul.f32 -1.442695, %v1248_v15 }
 0xbff   :  { %1519 = vpow2.f32 %v1423_v42 }
 0xc00   :  { %1521 = vpow2.f32 %v1424_v19 }
 0xc05   :  { %v1520_v32 = vpop.eup %1519 }
 0xc06   :  { %v1522_v20 = vpop.eup %1521  ;;  %v1257_v21 = vadd.f32 1.0, %v1520_v32 }
 0xc07   :  { %v1258_v22 = vadd.f32 1.0, %v1522_v20 }
 0xc08   :  { %1523 = vrcp.f32 %v1257_v21  ;;  %v1270_v58 = vand.u32 2147483648, %v1257_v21  ;;  %v1268_v41 = vand.u32 2147483647, %v1257_v21  ;;  %vm1264_vm2 = vweird.f32 %v1257_v21 }
 0xc09   :  { %1525 = vrcp.f32 %v1258_v22  ;;  %v1285_v55 = vand.u32 2147483648, %v1258_v22  ;;  %v1283_v44 = vand.u32 2147483647, %v1258_v22  ;;  %vm1279_vm4 = vweird.f32 %v1258_v22 }
 0xc0a   :  { %1527 = vtanh.f32 %v1248_v15  ;;  %v1271_v46 = vor.u32 1.1754944e-38, %v1270_v58  ;;  %vm1269_vm5 = vcmp.eq.f32.partialorder %v1268_v41, 8.507059e+37 }
 0xc0b   :  { %v1286_v50 = vor.u32 1.1754944e-38, %v1285_v55  ;;  %vm1284_vm1 = vcmp.eq.f32.partialorder %v1283_v44, 8.507059e+37 }
 0xc0e   :  { %v1524_v25 = vpop.eup %1523 }
 0xc0f   :  { %v1526_v26 = vpop.eup %1525  ;;  %v1260_v43 = vmul.f32 %v1524_v25, %v1257_v21  ;;  %vm1265_vm12 = vweird.f32 %v1524_v25 }
 0xc10   :  { %v1275_v31 = vmul.f32 %v1526_v26, %v1258_v22  ;;  %vm1280_vm13 = vweird.f32 %v1526_v26  ;;  %vm1266_vm3 = vmor %vm1264_vm2, %vm1265_vm12  ;;  %v1528_v53 = vpop.eup %1527  ;;  %vm1327_vm12 = vcmask 1046528  }
 0xc11   :  { %v1261_v47 = vsub.f32 1.0, %v1260_v43  ;;  %vm1281_vm6 = vmor %vm1279_vm4, %vm1280_vm13 }
 0xc12   :  { %v1276_v40 = vsub.f32 1.0, %v1275_v31 }
 0xc13   :  { %v1262_v48 = vmul.f32 %v1524_v25, %v1261_v47 }
 0xc14   :  { %v1277_v54 = vmul.f32 %v1526_v26, %v1276_v40 }
 0xc15   :  { %v1263_v49 = vadd.f32 %v1524_v25, %v1262_v48 }
 0xc16   :  { %v1278_v59 = vadd.f32 %v1526_v26, %v1277_v54 }
 0xc17   :  { %v1267_v60 = vsel %vm1266_vm3, %v1524_v25, %v1263_v49 }
 0xc18   :  { %v1272_v63 = vsel %vm1269_vm5, %v1271_v46, %v1267_v60  ;;  %v1282_v0 = vsel %vm1281_vm6, %v1526_v26, %v1278_v59 }
 0xc19   :  { %v1287_v1 = vsel %vm1284_vm1, %v1286_v50, %v1282_v0  ;;  %v1291_v7 = vmul.f32 %v1272_v63, %v1151_v35  ;;  %vm2280_vm1 = vcmask 523264  }
 0xc1a   :  { %v1290_v2 = vsel %vm116_vm7, %v1528_v53, %v1287_v1 }
 0xc1b   :  { %v1292_v6 = vmul.f32 %v1290_v2, %v1272_v63 }
 0xc1d   :  { %1294 = vrot.lane.b32.xlu1 %v1292_v6, %s1700_s3 }
 0xc8f   :  { %v1295_v9 = vpop.permute.xlu1 %1294 }
 0xc90   :  { %v1297_v11 = vadd.f32 %v1295_v9, %v1291_v7 }
 0xc92   :  { %1529 = vtanh.f32 %v1297_v11 }
 0xc98   :  { %v1530_v13 = vpop.eup %1529 }
 0xc99   :  { %v1299_v16 = vmul.f32 %v1530_v13, %v1290_v2 }
 0xc9b   :  { %v1343_v8 = vsel %vm1315_vm14, %v1299_v16, %v1329_v14  ;;  %v1313_v61 = vrot.slane %v1299_v16, 1 }
 0xc9c   :  { %v1344_v17 = vsel %vm1317_vm15, %v1343_v8, %v1331_v3 }
 0xc9d   :  { %v1328_v33 = vsel %vm1327_vm12, %v2244_v38, %v1313_v61  ;;  %v1345_v45 = vsel %vm1319_vm11, %v1344_v17, %v1333_v4 }
 0xc9e   :  { %1351 = vrot.lane.b32.xlu2 %v1328_v33, %s1700_s3  ;;  %v1346_v35 = vsel %vm1321_vm9, %v1345_v45, %v1335_v12 }
 0xc9f   :  { %v1347_v37 = vsel %vm1323_vm8, %v1346_v35, %v1337_v57 }
 0xca0   :  { %v1348_v10 = vsel %vm1325_vm10, %v1347_v37, %v1339_v36 }
 0xca1   :  { %v1349_v18 = vsel %vm1327_vm12, %v1348_v10, %v1341_v30 }
 0xca2   :  { %1355 = vrot.lane.b32.xlu0 %v1349_v18, %s1700_s3 }
 0xcf8   :  { %v1352_v62 = vpop.permute.xlu2 %1351 }
 0xd14   :  { %v1356_v34 = vpop.permute.xlu0 %1355 }
 0xd15   :  { %v1358_v52 = vsel %vm125_vm0, %v1352_v62, %v1356_v34 }
 0xd16   :  { %1359 = vst.msk [vmem:[#allocation10] sm:$0xff] %vm2280_vm1, %v1358_v52 }
 0xd17   :  { %1370 = dma.vmem_to_hbm [thread:$0]  %s1366_s10, 128, %s1368_s13, [#allocation4]  }
 0xd18   :  { %1690 = dma.done.wait [#allocation4], 128  }
 0xd19   :  { %1691 = vsyncadd [#allocation4], 4294967168 }
 0xd1a   :  { %1375 = vsyncpa [#allocation3], 1 }
 0xd1b   :  { %1376 = vsyncpa [#allocation6], 1 }
 0xd1c   :  { %1377 = vsyncpa [#allocation9], 1 }
 0xd1d   :  { %1378 = vsyncpa [#allocation4], 1 }

</bundles_post_ra>
